<compile_context>
chip_gen: v5e
topology: v5e:2x2
jax: 0.10.0
libtpu: 0.0.40
codegen_flags: <defaults>
</compile_context>

<pallas_src>
import numpy as np
import jax
import jax.numpy as jnp
from jax.experimental import pallas as pl
from jax.experimental.pallas import tpu as pltpu

C_IN, C_OUT, K = 1, 5, 3
STRIDE, PAD, OUT_PAD = 2, 4, 2
NEG_SLOPE = 0.43
CROP = PAD - (K - 1)   # crop (if >0) / pad (if <0) of the zero-dilated input


def _round_up(v, m):
    return ((v + m - 1) // m) * m


def _build_shift_mats(h_in, w_in, h_out_pad, w_out_pad):
    """0/1 matrices baking dilation + crop + (kh,kw) tap shift into two matmuls.

    win_{kh,kw} = d_mats[kh] @ x @ s_mats[kw]   gives   win[i, j] = x_eff[i+kh, j+kw]
    where x_eff is the zero-dilated, cropped (output-padded) input of the
    equivalent stride-1 direct convolution.  Out-of-support indices naturally
    map to zero rows/cols, so this is correct for any PAD / output_padding.
    """
    d_mats = np.zeros((K, h_out_pad, h_in), np.float32)
    for kh in range(K):
        for a in range(h_out_pad):
            t = a + kh + CROP
            if t >= 0 and t % STRIDE == 0 and t // STRIDE < h_in:
                d_mats[kh, a, t // STRIDE] = 1.0
    s_mats = np.zeros((K, w_in, w_out_pad), np.float32)
    for kw in range(K):
        for j in range(w_out_pad):
            t = j + kw + CROP
            if t >= 0 and t % STRIDE == 0 and t // STRIDE < w_in:
                s_mats[kw, t // STRIDE, j] = 1.0
    return d_mats, s_mats


def convt_leaky_kernel(x_ref, d_ref, s_ref, w_ref, b_ref, o_ref):
    # x_ref: (bn*H, W)                         VMEM  bn raw images stacked on sublanes
    # d_ref: (K, H_OUT_PAD, H)                 VMEM  constant row dilation/shift matrices
    # s_ref: (K, W, W_OUT_PAD)                 VMEM  constant col dilation/shift matrices
    # w_ref: (C_OUT*K*K,)                      SMEM  PyTorch weight, flattened, unflipped
    # b_ref: (C_OUT,)                          SMEM
    # o_ref: (bn, C_OUT, H_OUT_PAD, W_OUT_PAD) VMEM  lane-dense padded output slab
    bn = o_ref.shape[0]
    h_in = d_ref.shape[2]

    # Hoisted scalar loads: 45 weights + 5 biases, shared by every image in the block.
    # Direct-conv weight = spatially flipped transposed-conv weight.
    w_vals = [[[w_ref[oc * K * K + (K - 1 - kh) * K + (K - 1 - kw)]
                for kw in range(K)] for kh in range(K)] for oc in range(C_OUT)]
    b_vals = [b_ref[oc] for oc in range(C_OUT)]

    # One batched right-matmul per kw across ALL bn images (MXU, otherwise idle).
    x_all = x_ref[...].astype(jnp.float32)                            # (bn*H, W)
    t_cols = [jnp.dot(x_all, s_ref[kw], preferred_element_type=jnp.float32)
              for kw in range(K)]                                     # (bn*H, W_OUT_PAD)

    for bi in range(bn):
        accs = [None] * C_OUT
        for kw in range(K):
            t_img = t_cols[kw][bi * h_in:(bi + 1) * h_in, :]          # (H, W_OUT_PAD)
            for kh in range(K):
                # Shifted window via a second tiny matmul -> (H_OUT_PAD, W_OUT_PAD),
                # fully sublane/lane aligned (no unaligned slices, no rolls).
                win = jnp.dot(d_ref[kh], t_img, preferred_element_type=jnp.float32)
                for oc in range(C_OUT):        # 5 independent acc chains (VALU ILP)
                    prod = win * w_vals[oc][kh][kw]
                    accs[oc] = prod if accs[oc] is None else accs[oc] + prod
        for oc in range(C_OUT):
            y = accs[oc] + b_vals[oc]
            # where(y > 0, y, 0.43*y) == max(y, 0.43*y) because 0 < 0.43 < 1
            o_ref[bi, oc] = jnp.maximum(y, y * NEG_SLOPE)             # full-tile store


def _pick_bn(n):
    # Keep >= 2 grid steps whenever possible (so both v7x TensorCores get work;
    # the extra ~0.35us step is negligible on single-TC v5e/v6e), while packing
    # as many images per step as divide evenly (amortizes per-step overhead).
    if n <= 1:
        return 1
    bn = 1
    for cand in range(1, min(8, n) + 1):
        if n % cand == 0 and n // cand >= 2:
            bn = cand
    return bn


def conv_transpose_leaky(x, w_t, b):
    """x: (N, 1, H, W); w_t: (C_IN, C_OUT, K, K) (PyTorch ConvTranspose2d layout);
    b: (C_OUT,). Returns (N, C_OUT, H_out, W_out) float32."""
    n, ci, h, w = x.shape
    assert ci == C_IN
    h_out = (h - 1) * STRIDE - 2 * PAD + K + OUT_PAD
    w_out = (w - 1) * STRIDE - 2 * PAD + K + OUT_PAD
    assert h_out > 0 and w_out > 0, "module hyperparameters give empty output"

    h_out_pad = _round_up(h_out, 8)      # sublane-aligned rows
    w_out_pad = _round_up(w_out, 128)    # lane-dense columns

    d_np, s_np = _build_shift_mats(h, w, h_out_pad, w_out_pad)
    d_mats = jnp.asarray(d_np)           # (K, h_out_pad, h)
    s_mats = jnp.asarray(s_np)           # (K, w, w_out_pad)

    w_flat = w_t.reshape(C_OUT * K * K).astype(jnp.float32)
    b = b.astype(jnp.float32)
    x_flat = x.astype(jnp.float32).reshape(n * h, w)   # images stacked on sublanes

    bn = _pick_bn(n)
    assert n % bn == 0

    out_pad = pl.pallas_call(
        convt_leaky_kernel,
        out_shape=jax.ShapeDtypeStruct((n, C_OUT, h_out_pad, w_out_pad), jnp.float32),
        grid=(n // bn,),
        in_specs=[
            pl.BlockSpec((bn * h, w), lambda i: (i, 0)),
            pl.BlockSpec((K, h_out_pad, h), lambda i: (0, 0, 0)),
            pl.BlockSpec((K, w, w_out_pad), lambda i: (0, 0, 0)),
            pl.BlockSpec(memory_space=pltpu.MemorySpace.SMEM),
            pl.BlockSpec(memory_space=pltpu.MemorySpace.SMEM),
        ],
        out_specs=pl.BlockSpec((bn, C_OUT, h_out_pad, w_out_pad),
                               lambda i: (i, 0, 0, 0)),
        compiler_params=pltpu.CompilerParams(dimension_semantics=("parallel",)),
    )(x_flat, d_mats, s_mats, w_flat, b)

    # Crop the lane-dense slab back to the true output size (plain XLA slice).
    return out_pad[:, :, :h_out, :w_out]


def ref_convt_leaky(x, w, b):
    # Direct (slow) numpy reference for ConvTranspose2d + where.
    x = np.asarray(x); w = np.asarray(w); b = np.asarray(b)
    n, ci, h, wd = x.shape
    co = w.shape[1]
    ho = (h - 1) * STRIDE - 2 * PAD + K + OUT_PAD
    wo = (wd - 1) * STRIDE - 2 * PAD + K + OUT_PAD
    out = np.zeros((n, co, ho, wo), np.float32) + b[None, :, None, None]
    for nn in range(n):
        for c in range(ci):
            for o in range(co):
                for p in range(h):
                    for q in range(wd):
                        for kh in range(K):
                            for kw in range(K):
                                i = p * STRIDE - PAD + kh
                                j = q * STRIDE - PAD + kw
                                if 0 <= i < ho and 0 <= j < wo:
                                    out[nn, o, i, j] += x[nn, c, p, q] * w[c, o, kh, kw]
    return np.where(out > 0, out, out * NEG_SLOPE)


if __name__ == "__main__":
    key = jax.random.PRNGKey(0)
    kx, kw, kb = jax.random.split(key, 3)

    # Small shapes consistent with the module: batch=2, 1 input channel, 16x16 spatial.
    x = jax.random.normal(kx, (2, C_IN, 16, 16), jnp.float32)
    fan_in = C_OUT * K * K
    bound = 1.0 / np.sqrt(fan_in)
    w_t = jax.random.uniform(kw, (C_IN, C_OUT, K, K), jnp.float32, -bound, bound)
    b = jax.random.uniform(kb, (C_OUT,), jnp.float32, -bound, bound)

    out = jax.block_until_ready(conv_transpose_leaky(x, w_t, b))

    ref = ref_convt_leaky(x, w_t, b)
    assert out.shape == ref.shape == (2, C_OUT, 27, 27)
    np.testing.assert_allclose(np.asarray(out), ref, rtol=1e-4, atol=1e-4)

    print("KERNEL_OK")
</pallas_src>

<mosaic_0001>
module attributes {stable_mosaic.version = 11 : i64} {
  func.func @convt_leaky_kernel(%arg0: i32, %arg1: memref<16x16xf32, #tpu.memory_space<vmem>>, %arg2: memref<3x32x16xf32, #tpu.memory_space<vmem>>, %arg3: memref<3x16x128xf32, #tpu.memory_space<vmem>>, %arg4: memref<45xf32, #tpu.memory_space<smem>>, %arg5: memref<5xf32, #tpu.memory_space<smem>>, %arg6: memref<1x5x32x128xf32, #tpu.memory_space<vmem>>) attributes {dimension_semantics = [#tpu.dimension_semantics<parallel>], iteration_bounds = array<i64: 2>, scalar_prefetch = 0 : i64, scratch_operands = 0 : i64, tpu.core_type = #tpu.core_type<tc>, window_params = [{transform_indices = @transform_0, window_bounds = array<i64: 16, 16>}, {pipeline_mode = #tpu.pipeline_mode<synchronous>, transform_indices = @transform_1, window_bounds = array<i64: 3, 32, 16>}, {pipeline_mode = #tpu.pipeline_mode<synchronous>, transform_indices = @transform_2, window_bounds = array<i64: 3, 16, 128>}, {transform_indices = @transform_3, window_bounds = array<i64: 45>}, {transform_indices = @transform_4, window_bounds = array<i64: 5>}, {transform_indices = @transform_5, window_bounds = array<i64: 1, 5, 32, 128>}]} {
    %c8 = arith.constant 8 : index
    %0 = memref.load %arg4[%c8] : memref<45xf32, #tpu.memory_space<smem>>
    %c7 = arith.constant 7 : index
    %1 = memref.load %arg4[%c7] : memref<45xf32, #tpu.memory_space<smem>>
    %c6 = arith.constant 6 : index
    %2 = memref.load %arg4[%c6] : memref<45xf32, #tpu.memory_space<smem>>
    %c5 = arith.constant 5 : index
    %3 = memref.load %arg4[%c5] : memref<45xf32, #tpu.memory_space<smem>>
    %c4 = arith.constant 4 : index
    %4 = memref.load %arg4[%c4] : memref<45xf32, #tpu.memory_space<smem>>
    %c3 = arith.constant 3 : index
    %5 = memref.load %arg4[%c3] : memref<45xf32, #tpu.memory_space<smem>>
    %c2 = arith.constant 2 : index
    %6 = memref.load %arg4[%c2] : memref<45xf32, #tpu.memory_space<smem>>
    %c1 = arith.constant 1 : index
    %7 = memref.load %arg4[%c1] : memref<45xf32, #tpu.memory_space<smem>>
    %c0 = arith.constant 0 : index
    %8 = memref.load %arg4[%c0] : memref<45xf32, #tpu.memory_space<smem>>
    %c17 = arith.constant 17 : index
    %9 = memref.load %arg4[%c17] : memref<45xf32, #tpu.memory_space<smem>>
    %c16 = arith.constant 16 : index
    %10 = memref.load %arg4[%c16] : memref<45xf32, #tpu.memory_space<smem>>
    %c15 = arith.constant 15 : index
    %11 = memref.load %arg4[%c15] : memref<45xf32, #tpu.memory_space<smem>>
    %c14 = arith.constant 14 : index
    %12 = memref.load %arg4[%c14] : memref<45xf32, #tpu.memory_space<smem>>
    %c13 = arith.constant 13 : index
    %13 = memref.load %arg4[%c13] : memref<45xf32, #tpu.memory_space<smem>>
    %c12 = arith.constant 12 : index
    %14 = memref.load %arg4[%c12] : memref<45xf32, #tpu.memory_space<smem>>
    %c11 = arith.constant 11 : index
    %15 = memref.load %arg4[%c11] : memref<45xf32, #tpu.memory_space<smem>>
    %c10 = arith.constant 10 : index
    %16 = memref.load %arg4[%c10] : memref<45xf32, #tpu.memory_space<smem>>
    %c9 = arith.constant 9 : index
    %17 = memref.load %arg4[%c9] : memref<45xf32, #tpu.memory_space<smem>>
    %c26 = arith.constant 26 : index
    %18 = memref.load %arg4[%c26] : memref<45xf32, #tpu.memory_space<smem>>
    %c25 = arith.constant 25 : index
    %19 = memref.load %arg4[%c25] : memref<45xf32, #tpu.memory_space<smem>>
    %c24 = arith.constant 24 : index
    %20 = memref.load %arg4[%c24] : memref<45xf32, #tpu.memory_space<smem>>
    %c23 = arith.constant 23 : index
    %21 = memref.load %arg4[%c23] : memref<45xf32, #tpu.memory_space<smem>>
    %c22 = arith.constant 22 : index
    %22 = memref.load %arg4[%c22] : memref<45xf32, #tpu.memory_space<smem>>
    %c21 = arith.constant 21 : index
    %23 = memref.load %arg4[%c21] : memref<45xf32, #tpu.memory_space<smem>>
    %c20 = arith.constant 20 : index
    %24 = memref.load %arg4[%c20] : memref<45xf32, #tpu.memory_space<smem>>
    %c19 = arith.constant 19 : index
    %25 = memref.load %arg4[%c19] : memref<45xf32, #tpu.memory_space<smem>>
    %c18 = arith.constant 18 : index
    %26 = memref.load %arg4[%c18] : memref<45xf32, #tpu.memory_space<smem>>
    %c35 = arith.constant 35 : index
    %27 = memref.load %arg4[%c35] : memref<45xf32, #tpu.memory_space<smem>>
    %c34 = arith.constant 34 : index
    %28 = memref.load %arg4[%c34] : memref<45xf32, #tpu.memory_space<smem>>
    %c33 = arith.constant 33 : index
    %29 = memref.load %arg4[%c33] : memref<45xf32, #tpu.memory_space<smem>>
    %c32 = arith.constant 32 : index
    %30 = memref.load %arg4[%c32] : memref<45xf32, #tpu.memory_space<smem>>
    %c31 = arith.constant 31 : index
    %31 = memref.load %arg4[%c31] : memref<45xf32, #tpu.memory_space<smem>>
    %c30 = arith.constant 30 : index
    %32 = memref.load %arg4[%c30] : memref<45xf32, #tpu.memory_space<smem>>
    %c29 = arith.constant 29 : index
    %33 = memref.load %arg4[%c29] : memref<45xf32, #tpu.memory_space<smem>>
    %c28 = arith.constant 28 : index
    %34 = memref.load %arg4[%c28] : memref<45xf32, #tpu.memory_space<smem>>
    %c27 = arith.constant 27 : index
    %35 = memref.load %arg4[%c27] : memref<45xf32, #tpu.memory_space<smem>>
    %c44 = arith.constant 44 : index
    %36 = memref.load %arg4[%c44] : memref<45xf32, #tpu.memory_space<smem>>
    %c43 = arith.constant 43 : index
    %37 = memref.load %arg4[%c43] : memref<45xf32, #tpu.memory_space<smem>>
    %c42 = arith.constant 42 : index
    %38 = memref.load %arg4[%c42] : memref<45xf32, #tpu.memory_space<smem>>
    %c41 = arith.constant 41 : index
    %39 = memref.load %arg4[%c41] : memref<45xf32, #tpu.memory_space<smem>>
    %c40 = arith.constant 40 : index
    %40 = memref.load %arg4[%c40] : memref<45xf32, #tpu.memory_space<smem>>
    %c39 = arith.constant 39 : index
    %41 = memref.load %arg4[%c39] : memref<45xf32, #tpu.memory_space<smem>>
    %c38 = arith.constant 38 : index
    %42 = memref.load %arg4[%c38] : memref<45xf32, #tpu.memory_space<smem>>
    %c37 = arith.constant 37 : index
    %43 = memref.load %arg4[%c37] : memref<45xf32, #tpu.memory_space<smem>>
    %c36 = arith.constant 36 : index
    %44 = memref.load %arg4[%c36] : memref<45xf32, #tpu.memory_space<smem>>
    %c0_0 = arith.constant 0 : index
    %45 = memref.load %arg5[%c0_0] : memref<5xf32, #tpu.memory_space<smem>>
    %c1_1 = arith.constant 1 : index
    %46 = memref.load %arg5[%c1_1] : memref<5xf32, #tpu.memory_space<smem>>
    %c2_2 = arith.constant 2 : index
    %47 = memref.load %arg5[%c2_2] : memref<5xf32, #tpu.memory_space<smem>>
    %c3_3 = arith.constant 3 : index
    %48 = memref.load %arg5[%c3_3] : memref<5xf32, #tpu.memory_space<smem>>
    %c4_4 = arith.constant 4 : index
    %49 = memref.load %arg5[%c4_4] : memref<5xf32, #tpu.memory_space<smem>>
    %c0_5 = arith.constant 0 : index
    %c0_6 = arith.constant 0 : index
    %50 = vector.load %arg1[%c0_5, %c0_6] : memref<16x16xf32, #tpu.memory_space<vmem>>, vector<16x16xf32>
    %c0_7 = arith.constant 0 : index
    %c0_8 = arith.constant 0 : index
    %c0_9 = arith.constant 0 : index
    %51 = vector.load %arg3[%c0_7, %c0_8, %c0_9] : memref<3x16x128xf32, #tpu.memory_space<vmem>>, vector<1x16x128xf32>
    %52 = vector.shape_cast %51 : vector<1x16x128xf32> to vector<16x128xf32>
    %cst = arith.constant dense<0.000000e+00> : vector<16x128xf32>
    %53 = tpu.matmul %50, %52, %cst {dimension_numbers = #tpu.dot_dimension_numbers<[1], [0], [0], [1], [0, 0, 1, 1], [], []>} : vector<16x16xf32>, vector<16x128xf32>, vector<16x128xf32> -> vector<16x128xf32>
    %c1_10 = arith.constant 1 : index
    %c0_11 = arith.constant 0 : index
    %c0_12 = arith.constant 0 : index
    %54 = vector.load %arg3[%c1_10, %c0_11, %c0_12] : memref<3x16x128xf32, #tpu.memory_space<vmem>>, vector<1x16x128xf32>
    %55 = vector.shape_cast %54 : vector<1x16x128xf32> to vector<16x128xf32>
    %cst_13 = arith.constant dense<0.000000e+00> : vector<16x128xf32>
    %56 = tpu.matmul %50, %55, %cst_13 {dimension_numbers = #tpu.dot_dimension_numbers<[1], [0], [0], [1], [0, 0, 1, 1], [], []>} : vector<16x16xf32>, vector<16x128xf32>, vector<16x128xf32> -> vector<16x128xf32>
    %c2_14 = arith.constant 2 : index
    %c0_15 = arith.constant 0 : index
    %c0_16 = arith.constant 0 : index
    %57 = vector.load %arg3[%c2_14, %c0_15, %c0_16] : memref<3x16x128xf32, #tpu.memory_space<vmem>>, vector<1x16x128xf32>
    %58 = vector.shape_cast %57 : vector<1x16x128xf32> to vector<16x128xf32>
    %cst_17 = arith.constant dense<0.000000e+00> : vector<16x128xf32>
    %59 = tpu.matmul %50, %58, %cst_17 {dimension_numbers = #tpu.dot_dimension_numbers<[1], [0], [0], [1], [0, 0, 1, 1], [], []>} : vector<16x16xf32>, vector<16x128xf32>, vector<16x128xf32> -> vector<16x128xf32>
    %c0_18 = arith.constant 0 : index
    %c0_19 = arith.constant 0 : index
    %c0_20 = arith.constant 0 : index
    %60 = vector.load %arg2[%c0_18, %c0_19, %c0_20] : memref<3x32x16xf32, #tpu.memory_space<vmem>>, vector<1x32x16xf32>
    %61 = vector.shape_cast %60 : vector<1x32x16xf32> to vector<32x16xf32>
    %cst_21 = arith.constant dense<0.000000e+00> : vector<32x128xf32>
    %62 = tpu.matmul %61, %53, %cst_21 {dimension_numbers = #tpu.dot_dimension_numbers<[1], [0], [0], [1], [0, 0, 1, 1], [], []>} : vector<32x16xf32>, vector<16x128xf32>, vector<32x128xf32> -> vector<32x128xf32>
    %63 = vector.broadcast %0 : f32 to vector<32x128xf32>
    %64 = arith.mulf %62, %63 : vector<32x128xf32>
    %65 = vector.broadcast %9 : f32 to vector<32x128xf32>
    %66 = arith.mulf %62, %65 : vector<32x128xf32>
    %67 = vector.broadcast %18 : f32 to vector<32x128xf32>
    %68 = arith.mulf %62, %67 : vector<32x128xf32>
    %69 = vector.broadcast %27 : f32 to vector<32x128xf32>
    %70 = arith.mulf %62, %69 : vector<32x128xf32>
    %71 = vector.broadcast %36 : f32 to vector<32x128xf32>
    %72 = arith.mulf %62, %71 : vector<32x128xf32>
    %c1_22 = arith.constant 1 : index
    %c0_23 = arith.constant 0 : index
    %c0_24 = arith.constant 0 : index
    %73 = vector.load %arg2[%c1_22, %c0_23, %c0_24] : memref<3x32x16xf32, #tpu.memory_space<vmem>>, vector<1x32x16xf32>
    %74 = vector.shape_cast %73 : vector<1x32x16xf32> to vector<32x16xf32>
    %cst_25 = arith.constant dense<0.000000e+00> : vector<32x128xf32>
    %75 = tpu.matmul %74, %53, %cst_25 {dimension_numbers = #tpu.dot_dimension_numbers<[1], [0], [0], [1], [0, 0, 1, 1], [], []>} : vector<32x16xf32>, vector<16x128xf32>, vector<32x128xf32> -> vector<32x128xf32>
    %76 = vector.broadcast %3 : f32 to vector<32x128xf32>
    %77 = arith.mulf %75, %76 : vector<32x128xf32>
    %78 = arith.addf %64, %77 : vector<32x128xf32>
    %79 = vector.broadcast %12 : f32 to vector<32x128xf32>
    %80 = arith.mulf %75, %79 : vector<32x128xf32>
    %81 = arith.addf %66, %80 : vector<32x128xf32>
    %82 = vector.broadcast %21 : f32 to vector<32x128xf32>
    %83 = arith.mulf %75, %82 : vector<32x128xf32>
    %84 = arith.addf %68, %83 : vector<32x128xf32>
    %85 = vector.broadcast %30 : f32 to vector<32x128xf32>
    %86 = arith.mulf %75, %85 : vector<32x128xf32>
    %87 = arith.addf %70, %86 : vector<32x128xf32>
    %88 = vector.broadcast %39 : f32 to vector<32x128xf32>
    %89 = arith.mulf %75, %88 : vector<32x128xf32>
    %90 = arith.addf %72, %89 : vector<32x128xf32>
    %c2_26 = arith.constant 2 : index
    %c0_27 = arith.constant 0 : index
    %c0_28 = arith.constant 0 : index
    %91 = vector.load %arg2[%c2_26, %c0_27, %c0_28] : memref<3x32x16xf32, #tpu.memory_space<vmem>>, vector<1x32x16xf32>
    %92 = vector.shape_cast %91 : vector<1x32x16xf32> to vector<32x16xf32>
    %cst_29 = arith.constant dense<0.000000e+00> : vector<32x128xf32>
    %93 = tpu.matmul %92, %53, %cst_29 {dimension_numbers = #tpu.dot_dimension_numbers<[1], [0], [0], [1], [0, 0, 1, 1], [], []>} : vector<32x16xf32>, vector<16x128xf32>, vector<32x128xf32> -> vector<32x128xf32>
    %94 = vector.broadcast %6 : f32 to vector<32x128xf32>
    %95 = arith.mulf %93, %94 : vector<32x128xf32>
    %96 = arith.addf %78, %95 : vector<32x128xf32>
    %97 = vector.broadcast %15 : f32 to vector<32x128xf32>
    %98 = arith.mulf %93, %97 : vector<32x128xf32>
    %99 = arith.addf %81, %98 : vector<32x128xf32>
    %100 = vector.broadcast %24 : f32 to vector<32x128xf32>
    %101 = arith.mulf %93, %100 : vector<32x128xf32>
    %102 = arith.addf %84, %101 : vector<32x128xf32>
    %103 = vector.broadcast %33 : f32 to vector<32x128xf32>
    %104 = arith.mulf %93, %103 : vector<32x128xf32>
    %105 = arith.addf %87, %104 : vector<32x128xf32>
    %106 = vector.broadcast %42 : f32 to vector<32x128xf32>
    %107 = arith.mulf %93, %106 : vector<32x128xf32>
    %108 = arith.addf %90, %107 : vector<32x128xf32>
    %c0_30 = arith.constant 0 : index
    %c0_31 = arith.constant 0 : index
    %c0_32 = arith.constant 0 : index
    %109 = vector.load %arg2[%c0_30, %c0_31, %c0_32] : memref<3x32x16xf32, #tpu.memory_space<vmem>>, vector<1x32x16xf32>
    %110 = vector.shape_cast %109 : vector<1x32x16xf32> to vector<32x16xf32>
    %cst_33 = arith.constant dense<0.000000e+00> : vector<32x128xf32>
    %111 = tpu.matmul %110, %56, %cst_33 {dimension_numbers = #tpu.dot_dimension_numbers<[1], [0], [0], [1], [0, 0, 1, 1], [], []>} : vector<32x16xf32>, vector<16x128xf32>, vector<32x128xf32> -> vector<32x128xf32>
    %112 = vector.broadcast %1 : f32 to vector<32x128xf32>
    %113 = arith.mulf %111, %112 : vector<32x128xf32>
    %114 = arith.addf %96, %113 : vector<32x128xf32>
    %115 = vector.broadcast %10 : f32 to vector<32x128xf32>
    %116 = arith.mulf %111, %115 : vector<32x128xf32>
    %117 = arith.addf %99, %116 : vector<32x128xf32>
    %118 = vector.broadcast %19 : f32 to vector<32x128xf32>
    %119 = arith.mulf %111, %118 : vector<32x128xf32>
    %120 = arith.addf %102, %119 : vector<32x128xf32>
    %121 = vector.broadcast %28 : f32 to vector<32x128xf32>
    %122 = arith.mulf %111, %121 : vector<32x128xf32>
    %123 = arith.addf %105, %122 : vector<32x128xf32>
    %124 = vector.broadcast %37 : f32 to vector<32x128xf32>
    %125 = arith.mulf %111, %124 : vector<32x128xf32>
    %126 = arith.addf %108, %125 : vector<32x128xf32>
    %c1_34 = arith.constant 1 : index
    %c0_35 = arith.constant 0 : index
    %c0_36 = arith.constant 0 : index
    %127 = vector.load %arg2[%c1_34, %c0_35, %c0_36] : memref<3x32x16xf32, #tpu.memory_space<vmem>>, vector<1x32x16xf32>
    %128 = vector.shape_cast %127 : vector<1x32x16xf32> to vector<32x16xf32>
    %cst_37 = arith.constant dense<0.000000e+00> : vector<32x128xf32>
    %129 = tpu.matmul %128, %56, %cst_37 {dimension_numbers = #tpu.dot_dimension_numbers<[1], [0], [0], [1], [0, 0, 1, 1], [], []>} : vector<32x16xf32>, vector<16x128xf32>, vector<32x128xf32> -> vector<32x128xf32>
    %130 = vector.broadcast %4 : f32 to vector<32x128xf32>
    %131 = arith.mulf %129, %130 : vector<32x128xf32>
    %132 = arith.addf %114, %131 : vector<32x128xf32>
    %133 = vector.broadcast %13 : f32 to vector<32x128xf32>
    %134 = arith.mulf %129, %133 : vector<32x128xf32>
    %135 = arith.addf %117, %134 : vector<32x128xf32>
    %136 = vector.broadcast %22 : f32 to vector<32x128xf32>
    %137 = arith.mulf %129, %136 : vector<32x128xf32>
    %138 = arith.addf %120, %137 : vector<32x128xf32>
    %139 = vector.broadcast %31 : f32 to vector<32x128xf32>
    %140 = arith.mulf %129, %139 : vector<32x128xf32>
    %141 = arith.addf %123, %140 : vector<32x128xf32>
    %142 = vector.broadcast %40 : f32 to vector<32x128xf32>
    %143 = arith.mulf %129, %142 : vector<32x128xf32>
    %144 = arith.addf %126, %143 : vector<32x128xf32>
    %c2_38 = arith.constant 2 : index
    %c0_39 = arith.constant 0 : index
    %c0_40 = arith.constant 0 : index
    %145 = vector.load %arg2[%c2_38, %c0_39, %c0_40] : memref<3x32x16xf32, #tpu.memory_space<vmem>>, vector<1x32x16xf32>
    %146 = vector.shape_cast %145 : vector<1x32x16xf32> to vector<32x16xf32>
    %cst_41 = arith.constant dense<0.000000e+00> : vector<32x128xf32>
    %147 = tpu.matmul %146, %56, %cst_41 {dimension_numbers = #tpu.dot_dimension_numbers<[1], [0], [0], [1], [0, 0, 1, 1], [], []>} : vector<32x16xf32>, vector<16x128xf32>, vector<32x128xf32> -> vector<32x128xf32>
    %148 = vector.broadcast %7 : f32 to vector<32x128xf32>
    %149 = arith.mulf %147, %148 : vector<32x128xf32>
    %150 = arith.addf %132, %149 : vector<32x128xf32>
    %151 = vector.broadcast %16 : f32 to vector<32x128xf32>
    %152 = arith.mulf %147, %151 : vector<32x128xf32>
    %153 = arith.addf %135, %152 : vector<32x128xf32>
    %154 = vector.broadcast %25 : f32 to vector<32x128xf32>
    %155 = arith.mulf %147, %154 : vector<32x128xf32>
    %156 = arith.addf %138, %155 : vector<32x128xf32>
    %157 = vector.broadcast %34 : f32 to vector<32x128xf32>
    %158 = arith.mulf %147, %157 : vector<32x128xf32>
    %159 = arith.addf %141, %158 : vector<32x128xf32>
    %160 = vector.broadcast %43 : f32 to vector<32x128xf32>
    %161 = arith.mulf %147, %160 : vector<32x128xf32>
    %162 = arith.addf %144, %161 : vector<32x128xf32>
    %c0_42 = arith.constant 0 : index
    %c0_43 = arith.constant 0 : index
    %c0_44 = arith.constant 0 : index
    %163 = vector.load %arg2[%c0_42, %c0_43, %c0_44] : memref<3x32x16xf32, #tpu.memory_space<vmem>>, vector<1x32x16xf32>
    %164 = vector.shape_cast %163 : vector<1x32x16xf32> to vector<32x16xf32>
    %cst_45 = arith.constant dense<0.000000e+00> : vector<32x128xf32>
    %165 = tpu.matmul %164, %59, %cst_45 {dimension_numbers = #tpu.dot_dimension_numbers<[1], [0], [0], [1], [0, 0, 1, 1], [], []>} : vector<32x16xf32>, vector<16x128xf32>, vector<32x128xf32> -> vector<32x128xf32>
    %166 = vector.broadcast %2 : f32 to vector<32x128xf32>
    %167 = arith.mulf %165, %166 : vector<32x128xf32>
    %168 = arith.addf %150, %167 : vector<32x128xf32>
    %169 = vector.broadcast %11 : f32 to vector<32x128xf32>
    %170 = arith.mulf %165, %169 : vector<32x128xf32>
    %171 = arith.addf %153, %170 : vector<32x128xf32>
    %172 = vector.broadcast %20 : f32 to vector<32x128xf32>
    %173 = arith.mulf %165, %172 : vector<32x128xf32>
    %174 = arith.addf %156, %173 : vector<32x128xf32>
    %175 = vector.broadcast %29 : f32 to vector<32x128xf32>
    %176 = arith.mulf %165, %175 : vector<32x128xf32>
    %177 = arith.addf %159, %176 : vector<32x128xf32>
    %178 = vector.broadcast %38 : f32 to vector<32x128xf32>
    %179 = arith.mulf %165, %178 : vector<32x128xf32>
    %180 = arith.addf %162, %179 : vector<32x128xf32>
    %c1_46 = arith.constant 1 : index
    %c0_47 = arith.constant 0 : index
    %c0_48 = arith.constant 0 : index
    %181 = vector.load %arg2[%c1_46, %c0_47, %c0_48] : memref<3x32x16xf32, #tpu.memory_space<vmem>>, vector<1x32x16xf32>
    %182 = vector.shape_cast %181 : vector<1x32x16xf32> to vector<32x16xf32>
    %cst_49 = arith.constant dense<0.000000e+00> : vector<32x128xf32>
    %183 = tpu.matmul %182, %59, %cst_49 {dimension_numbers = #tpu.dot_dimension_numbers<[1], [0], [0], [1], [0, 0, 1, 1], [], []>} : vector<32x16xf32>, vector<16x128xf32>, vector<32x128xf32> -> vector<32x128xf32>
    %184 = vector.broadcast %5 : f32 to vector<32x128xf32>
    %185 = arith.mulf %183, %184 : vector<32x128xf32>
    %186 = arith.addf %168, %185 : vector<32x128xf32>
    %187 = vector.broadcast %14 : f32 to vector<32x128xf32>
    %188 = arith.mulf %183, %187 : vector<32x128xf32>
    %189 = arith.addf %171, %188 : vector<32x128xf32>
    %190 = vector.broadcast %23 : f32 to vector<32x128xf32>
    %191 = arith.mulf %183, %190 : vector<32x128xf32>
    %192 = arith.addf %174, %191 : vector<32x128xf32>
    %193 = vector.broadcast %32 : f32 to vector<32x128xf32>
    %194 = arith.mulf %183, %193 : vector<32x128xf32>
    %195 = arith.addf %177, %194 : vector<32x128xf32>
    %196 = vector.broadcast %41 : f32 to vector<32x128xf32>
    %197 = arith.mulf %183, %196 : vector<32x128xf32>
    %198 = arith.addf %180, %197 : vector<32x128xf32>
    %c2_50 = arith.constant 2 : index
    %c0_51 = arith.constant 0 : index
    %c0_52 = arith.constant 0 : index
    %199 = vector.load %arg2[%c2_50, %c0_51, %c0_52] : memref<3x32x16xf32, #tpu.memory_space<vmem>>, vector<1x32x16xf32>
    %200 = vector.shape_cast %199 : vector<1x32x16xf32> to vector<32x16xf32>
    %cst_53 = arith.constant dense<0.000000e+00> : vector<32x128xf32>
    %201 = tpu.matmul %200, %59, %cst_53 {dimension_numbers = #tpu.dot_dimension_numbers<[1], [0], [0], [1], [0, 0, 1, 1], [], []>} : vector<32x16xf32>, vector<16x128xf32>, vector<32x128xf32> -> vector<32x128xf32>
    %202 = vector.broadcast %8 : f32 to vector<32x128xf32>
    %203 = arith.mulf %201, %202 : vector<32x128xf32>
    %204 = arith.addf %186, %203 : vector<32x128xf32>
    %205 = vector.broadcast %17 : f32 to vector<32x128xf32>
    %206 = arith.mulf %201, %205 : vector<32x128xf32>
    %207 = arith.addf %189, %206 : vector<32x128xf32>
    %208 = vector.broadcast %26 : f32 to vector<32x128xf32>
    %209 = arith.mulf %201, %208 : vector<32x128xf32>
    %210 = arith.addf %192, %209 : vector<32x128xf32>
    %211 = vector.broadcast %35 : f32 to vector<32x128xf32>
    %212 = arith.mulf %201, %211 : vector<32x128xf32>
    %213 = arith.addf %195, %212 : vector<32x128xf32>
    %214 = vector.broadcast %44 : f32 to vector<32x128xf32>
    %215 = arith.mulf %201, %214 : vector<32x128xf32>
    %216 = arith.addf %198, %215 : vector<32x128xf32>
    %217 = vector.broadcast %45 : f32 to vector<32x128xf32>
    %218 = arith.addf %204, %217 : vector<32x128xf32>
    %cst_54 = arith.constant 4.300000e-01 : f32
    %219 = vector.broadcast %cst_54 : f32 to vector<32x128xf32>
    %220 = arith.mulf %218, %219 : vector<32x128xf32>
    %221 = arith.maximumf %218, %220 : vector<32x128xf32>
    %c0_55 = arith.constant 0 : index
    %c0_56 = arith.constant 0 : index
    %c0_57 = arith.constant 0 : index
    %c0_58 = arith.constant 0 : index
    %222 = vector.load %arg6[%c0_55, %c0_56, %c0_57, %c0_58] : memref<1x5x32x128xf32, #tpu.memory_space<vmem>>, vector<1x1x32x128xf32>
    %223 = vector.shape_cast %222 : vector<1x1x32x128xf32> to vector<32x128xf32>
    %224 = vector.shape_cast %221 : vector<32x128xf32> to vector<1x1x32x128xf32>
    tpu.vector_store %arg6[%c0_55, %c0_56, %c0_57, %c0_58], %224 {strides = array<i32>} : memref<1x5x32x128xf32, #tpu.memory_space<vmem>>, vector<1x1x32x128xf32>,
    %225 = vector.broadcast %46 : f32 to vector<32x128xf32>
    %226 = arith.addf %207, %225 : vector<32x128xf32>
    %cst_59 = arith.constant 4.300000e-01 : f32
    %227 = vector.broadcast %cst_59 : f32 to vector<32x128xf32>
    %228 = arith.mulf %226, %227 : vector<32x128xf32>
    %229 = arith.maximumf %226, %228 : vector<32x128xf32>
    %c0_60 = arith.constant 0 : index
    %c1_61 = arith.constant 1 : index
    %c0_62 = arith.constant 0 : index
    %c0_63 = arith.constant 0 : index
    %230 = vector.load %arg6[%c0_60, %c1_61, %c0_62, %c0_63] : memref<1x5x32x128xf32, #tpu.memory_space<vmem>>, vector<1x1x32x128xf32>
    %231 = vector.shape_cast %230 : vector<1x1x32x128xf32> to vector<32x128xf32>
    %232 = vector.shape_cast %229 : vector<32x128xf32> to vector<1x1x32x128xf32>
    tpu.vector_store %arg6[%c0_60, %c1_61, %c0_62, %c0_63], %232 {strides = array<i32>} : memref<1x5x32x128xf32, #tpu.memory_space<vmem>>, vector<1x1x32x128xf32>,
    %233 = vector.broadcast %47 : f32 to vector<32x128xf32>
    %234 = arith.addf %210, %233 : vector<32x128xf32>
    %cst_64 = arith.constant 4.300000e-01 : f32
    %235 = vector.broadcast %cst_64 : f32 to vector<32x128xf32>
    %236 = arith.mulf %234, %235 : vector<32x128xf32>
    %237 = arith.maximumf %234, %236 : vector<32x128xf32>
    %c0_65 = arith.constant 0 : index
    %c2_66 = arith.constant 2 : index
    %c0_67 = arith.constant 0 : index
    %c0_68 = arith.constant 0 : index
    %238 = vector.load %arg6[%c0_65, %c2_66, %c0_67, %c0_68] : memref<1x5x32x128xf32, #tpu.memory_space<vmem>>, vector<1x1x32x128xf32>
    %239 = vector.shape_cast %238 : vector<1x1x32x128xf32> to vector<32x128xf32>
    %240 = vector.shape_cast %237 : vector<32x128xf32> to vector<1x1x32x128xf32>
    tpu.vector_store %arg6[%c0_65, %c2_66, %c0_67, %c0_68], %240 {strides = array<i32>} : memref<1x5x32x128xf32, #tpu.memory_space<vmem>>, vector<1x1x32x128xf32>,
    %241 = vector.broadcast %48 : f32 to vector<32x128xf32>
    %242 = arith.addf %213, %241 : vector<32x128xf32>
    %cst_69 = arith.constant 4.300000e-01 : f32
    %243 = vector.broadcast %cst_69 : f32 to vector<32x128xf32>
    %244 = arith.mulf %242, %243 : vector<32x128xf32>
    %245 = arith.maximumf %242, %244 : vector<32x128xf32>
    %c0_70 = arith.constant 0 : index
    %c3_71 = arith.constant 3 : index
    %c0_72 = arith.constant 0 : index
    %c0_73 = arith.constant 0 : index
    %246 = vector.load %arg6[%c0_70, %c3_71, %c0_72, %c0_73] : memref<1x5x32x128xf32, #tpu.memory_space<vmem>>, vector<1x1x32x128xf32>
    %247 = vector.shape_cast %246 : vector<1x1x32x128xf32> to vector<32x128xf32>
    %248 = vector.shape_cast %245 : vector<32x128xf32> to vector<1x1x32x128xf32>
    tpu.vector_store %arg6[%c0_70, %c3_71, %c0_72, %c0_73], %248 {strides = array<i32>} : memref<1x5x32x128xf32, #tpu.memory_space<vmem>>, vector<1x1x32x128xf32>,
    %249 = vector.broadcast %49 : f32 to vector<32x128xf32>
    %250 = arith.addf %216, %249 : vector<32x128xf32>
    %cst_74 = arith.constant 4.300000e-01 : f32
    %251 = vector.broadcast %cst_74 : f32 to vector<32x128xf32>
    %252 = arith.mulf %250, %251 : vector<32x128xf32>
    %253 = arith.maximumf %250, %252 : vector<32x128xf32>
    %c0_75 = arith.constant 0 : index
    %c4_76 = arith.constant 4 : index
    %c0_77 = arith.constant 0 : index
    %c0_78 = arith.constant 0 : index
    %254 = vector.load %arg6[%c0_75, %c4_76, %c0_77, %c0_78] : memref<1x5x32x128xf32, #tpu.memory_space<vmem>>, vector<1x1x32x128xf32>
    %255 = vector.shape_cast %254 : vector<1x1x32x128xf32> to vector<32x128xf32>
    %256 = vector.shape_cast %253 : vector<32x128xf32> to vector<1x1x32x128xf32>
    tpu.vector_store %arg6[%c0_75, %c4_76, %c0_77, %c0_78], %256 {strides = array<i32>} : memref<1x5x32x128xf32, #tpu.memory_space<vmem>>, vector<1x1x32x128xf32>,
    return
  }
  func.func @transform_0(%arg0: i32) -> (i32, i32) {
    %c0_i32 = arith.constant 0 : i32
    %c0_i32_0 = arith.constant 0 : i32
    return %arg0, %c0_i32 : i32, i32
  }
  func.func @transform_1(%arg0: i32) -> (i32, i32, i32) {
    %c0_i32 = arith.constant 0 : i32
    %c0_i32_0 = arith.constant 0 : i32
    %c0_i32_1 = arith.constant 0 : i32
    %c0_i32_2 = arith.constant 0 : i32
    return %c0_i32, %c0_i32_0, %c0_i32_1 : i32, i32, i32
  }
  func.func @transform_2(%arg0: i32) -> (i32, i32, i32) {
    %c0_i32 = arith.constant 0 : i32
    %c0_i32_0 = arith.constant 0 : i32
    %c0_i32_1 = arith.constant 0 : i32
    %c0_i32_2 = arith.constant 0 : i32
    return %c0_i32, %c0_i32_0, %c0_i32_1 : i32, i32, i32
  }
  func.func @transform_3(%arg0: i32) -> i32 {
    %c0_i32 = arith.constant 0 : i32
    %c0_i32_0 = arith.constant 0 : i32
    return %c0_i32 : i32
  }
  func.func @transform_4(%arg0: i32) -> i32 {
    %c0_i32 = arith.constant 0 : i32
    %c0_i32_0 = arith.constant 0 : i32
    return %c0_i32 : i32
  }
  func.func @transform_5(%arg0: i32) -> (i32, i32, i32, i32) {
    %c0_i32 = arith.constant 0 : i32
    %c0_i32_0 = arith.constant 0 : i32
    %c0_i32_1 = arith.constant 0 : i32
    %c0_i32_2 = arith.constant 0 : i32
    return %arg0, %c0_i32, %c0_i32_0, %c0_i32_1 : i32, i32, i32, i32
  }
}

</mosaic_0001>

<bundles_post_ra>
// kernel: tpu_custom_call.1
= control target key start
LH: loop header
LB: loop body
LE: loop exit
PB: predicated region body
PF: predicated region fallthrough
CT: control target
= control target key end

     0   :  { %s2382_s0 = inlined_call_operand.vmem [shape: f32[32,16], index: 0, kind: input, shape index: {}]   ;;  %s2383_s1 = inlined_call_operand.vmem [shape: f32[3,32,16], index: 1, kind: input, shape index: {}]   ;;  %s2384_s2 = inlined_call_operand.vmem [shape: f32[3,16,128], index: 2, kind: input, shape index: {}]   ;;  %s2385_s3 = inlined_call_operand.vmem [shape: f32[45], index: 3, kind: input, shape index: {}]   ;;  %s2386_s4 = inlined_call_operand.vmem [shape: f32[5], index: 4, kind: input, shape index: {}]   ;;  %s2387_s5 = inlined_call_operand.hbm [shape: f32[2,5,32,128], index: 5, kind: output, shape index: {}]  }
   0x1   :  { %2393 = sst [smem:[#allocation18_spill]] %s2382_s0 }
   0x2   :  { %2394 = sst [smem:[#allocation19_spill]] %s2383_s1 }
   0x3   :  { %2395 = sst [smem:[#allocation20_spill]] %s2384_s2 }
   0x4   :  { %2396 = sst [smem:[#allocation21_spill]] %s2385_s3 }
   0x5   :  { %2397 = sst [smem:[#allocation22_spill]] %s2386_s4 }
   0x6   :  { %10 = vsyncpa [#allocation4], 0 }
   0x7   :  { %11 = vsyncpa [#allocation6], 0 }
   0x8   :  { %12 = vsyncpa [#allocation3], 0 }
   0x9   :  { %14 = vsyncpa [#allocation3 + $0x1], 0  ;;  %s1606_s18 = smov 0   ;;  %s1608_s19 = smov 0  }
   0xa   :  { %s1610_s20 = smov 0   ;;  %s1612_s21 = smov 0  }
   0xb LB: > { %2398 = sst [smem:[#allocation11_spill]] %s1566_s20  ;;  %s1627_s22 = sadd.s32 4294967295, %s1570_s21   ;;  %s1570_s21 = sphi %s1612_s21, %s2416_s21   ;;  %s1566_s20 = sphi %s1610_s20, %s2418_s20   ;;  %s1562_s19 = sphi %s1608_s19, %s2420_s19   ;;  %s1558_s18 = sphi %s1606_s18, %s2419_s18  }
   0xc   : > { %s1273_s23 = sadd.s32 4294967294, %s1570_s21   ;;  %s1631_s24 = sadd.s32 1, %s1570_s21  }
   0xd   : > { %2399 = sst [smem:[#allocation12_spill]] %s1631_s24  ;;  %s137_s25 = sadd.s32 1, %s1566_s20 }
   0xe   : > { %s134_s26 = ssub.s32 %s1570_s21, %s1631_s24  ;;  %p147_p0 = scmp.ne.s32.totalorder %s1566_s20, %s1562_s19 }
   0xf   : > { %p135_p1 = scmp.eq.s32.totalorder %s134_s26, 0  ;;  %p148_p2 = scmp.eq.s32.totalorder %s1627_s22, 1 }
  0x10   : > { %p153_p3 = scmp.ne.s32.totalorder %s1562_s19, %s1558_s18  ;;  %p154_p4 = scmp.eq.s32.totalorder %s1273_s23, 1 }
  0x11   : > { %s1642_s27 = scalar_select %p135_p1, %s1566_s20, %s137_s25  }
  0x12   : > { %p1644_p5 = por %p148_p2, %p147_p0  ;;  %p1648_p6 = por %p154_p4, %p153_p3 }
  0x13   : > { %2400 = sst [smem:[#allocation13_spill]] %s1642_s27  ;;  %p1274_p7 = scmp.ge.s32.totalorder %s1570_s21, 1 }
  0x14   : > { %s2402_s29 = scalar_select %p1648_p6, 1, 0 }
  0x15   : > { %p161_p8 = scmp.lt.s32.totalorder %s1570_s21, 3  ;;  %p1429_p9 = scmp.eq.s32.totalorder %s1627_s22, 0 }
  0x16   : > { %2403 = sst [smem:[#allocation14_spill]] %s2402_s29  ;;  %s1572_s11 = smov [#allocation2]  }
  0x17   : > { %p162_p10 = pnand %p1274_p7, %p161_p8  ;;  %s2404_s3 = sld [smem:[#allocation21_spill]] }
  0x18   : > { %s2405_s4 = sld [smem:[#allocation22_spill]]  ;;  %s1573_s12 = smov [#allocation5]  }
  0x19   : > { %p1418_p11 = pneg %p162_p10 }
  0x1b   : > { %p1419_p12 = pnand %p1429_p9, %p1418_p11 }
  0x1c   : > { %211 = sbr.rel (%p162_p10) target bundleno = 432 (0x1b0), region = 40 }
  0x1d   : > { %s179_s7 = sshll.u32 %s2404_s3, 4  ;;  %s180_s7 = int_to_ptr.vmem [resolvable:$true] %s179_s7 }
  0x1e   : > { %s189_s10 = sshll.u32 %s2405_s4, 4  ;;  %s190_s10 = int_to_ptr.vmem [resolvable:$true] %s189_s10 }
  0x1f   : > { %1421 = dma.vmem_to_smem (!%p1419_p12), %s180_s7, 16, %s1572_s11, [#allocation4]  }
  0x20   : > { %1424 = dma.vmem_to_smem (!%p1419_p12), %s190_s10, 16, %s1573_s12, [#allocation6]  }
  0x21   : > { %1545 = dma.done.wait (%p1429_p9), [#allocation4], 16  }
  0x22   : > { %1547 = vsyncadd (%p1429_p9), [#allocation4], 4294967280 }
  0x23   : > { %1549 = dma.done.wait (%p1429_p9), [#allocation6], 16  }
  0x24   : > { %1551 = vsyncadd (%p1429_p9), [#allocation6], 4294967280 }
  0x25   : > { %223 = sfence }
  0x26   : > { %s2406_s2 = sld [smem:[#allocation20_spill]]  ;;  %s1281_s25 = sshll.u32 %s1627_s22, 1  ;;  %vm306_vm0 = vcmask 130048  }
  0x27   : > { %p247_p13 = scmp.lt.s32.totalorder %s1281_s25, 3  ;;  %s2407_s0 = sld [smem:[#allocation18_spill]] }
  0x28   : > { %s2408_s1 = sld [smem:[#allocation19_spill]] }
  0x29   : > { %s2422_s25 = smov (!%p247_p13, %s1281_s25), 3  ;;  %s1283_s6 = sld [smem:[#allocation2 + $0x8]] }
  0x2a   : > { %s1282_s10 = sshll.u32 %s2422_s25, 3  ;;  %s1291_s7 = sld [smem:[#allocation2 + $0x11]] }
  0x2b   : > { %s1300_s8 = sld [smem:[#allocation2 + $0x1a]] }
  0x2c   : > { %v305_v0 = vld [vmem:[%s2406_s2 + $0x8] sm:$0xff]  ;;  %v1334_v1 = vld [vmem:[%s2406_s2 + $0x18] sm:$0xff]  ;;  %v304_v2 = vld [vmem:[%s2406_s2] sm:$0xff]  ;;  %s1309_s9 = sld [smem:[#allocation2 + $0x23]] }
  0x2d   : > { %327 = vmatpush.msra.mxu0 %v305_v0  ;;  %353 = vmatpush.msra.mxu1 %v1334_v1  ;;  %v1333_v3 = vld [vmem:[%s2406_s2 + $0x10] sm:$0xff]  ;;  %v1338_v4 = vld [vmem:[%s2406_s2 + $0x28] sm:$0xff]  ;;  %v1337_v5 = vld [vmem:[%s2406_s2 + $0x20] sm:$0xff]  ;;  %s250_s13 = scalar_lea.vmem %s2407_s0, %s1282_s10  ;;  %s1318_s10 = sld [smem:[#allocation2 + $0x2c]] }
  0x2e   : > { %379 = vmatpush.msra.mxu2 %v1338_v4  ;;  %v302_v6 = vld [vmem:[%s250_s13] sm:$0xff]  ;;  %v303_v7 = vld [vmem:[%s250_s13 + $0x8] sm:$0xff]  ;;  %v390_v17 = vld [vmem:[%s2408_s1 + $0x10] sm:$0xff]  ;;  %s1286_s11 = sld [smem:[#allocation2 + $0x5]] }
  0x2f   : > { %328 = vmatpush.msra.mxu0 %v304_v2  ;;  %354 = vmatpush.msra.mxu1 %v1333_v3  ;;  %v388_v13 = vld [vmem:[%s2408_s1] sm:$0xff]  ;;  %v389_v14 = vld [vmem:[%s2408_s1 + $0x8] sm:$0xff]  ;;  %v391_v20 = vld [vmem:[%s2408_s1 + $0x18] sm:$0xff]  ;;  %s1294_s12 = sld [smem:[#allocation2 + $0xe]]  ;;  %v1773_v26 = vstv %s1283_s6 }
  0x30   : > { %380 = vmatpush.msra.mxu2 %v1337_v5  ;;  %1331 = vmatmul.msk.f32.vlgmr.msra.gmra.mxu0 %vm306_vm0, %v302_v6  ;;  %v1353_v15 = vld [vmem:[%s2408_s1 + $0x40] sm:$0xff]  ;;  %v1354_v19 = vld [vmem:[%s2408_s1 + $0x48] sm:$0xff]  ;;  %v1355_v22 = vld [vmem:[%s2408_s1 + $0x50] sm:$0xff]  ;;  %s1303_s13 = sld [smem:[#allocation2 + $0x17]]  ;;  %v1775_v27 = vstv %s1291_s7 }
  0x31   : > { %1335 = vmatmul.msk.f32.vlgmr.msra.gmra.mxu1 %vm306_vm0, %v302_v6  ;;  %1339 = vmatmul.msk.f32.vlgmr.msra.gmra.mxu2 %vm306_vm0, %v302_v6  ;;  %v1345_v18 = vld [vmem:[%s2408_s1 + $0x20] sm:$0xff]  ;;  %v1346_v21 = vld [vmem:[%s2408_s1 + $0x28] sm:$0xff]  ;;  %v1347_v23 = vld [vmem:[%s2408_s1 + $0x30] sm:$0xff]  ;;  %s1312_s14 = sld [smem:[#allocation2 + $0x20]]  ;;  %v1777_v28 = vstv %s1300_s8 }
  0x32   : > { %v1356_v24 = vld [vmem:[%s2408_s1 + $0x58] sm:$0xff]  ;;  %s1321_s15 = sld [smem:[#allocation2 + $0x29]]  ;;  %v1779_v29 = vstv %s1309_s9 }
  0x33   : > { %v1348_v25 = vld [vmem:[%s2408_s1 + $0x38] sm:$0xff]  ;;  %s1289_s16 = sld [smem:[#allocation2 + $0x2]]  ;;  %v1781_v31 = vstv %s1318_s10 }
  0x34   : > { %s1297_s17 = sld [smem:[#allocation2 + $0xb]]  ;;  %v1783_v32 = vstv %s1286_s11 }
  0x35   : > { %s1306_s23 = sld [smem:[#allocation2 + $0x14]]  ;;  %v1785_v33 = vstv %s1294_s12 }
  0x36   : > { %s1315_s25 = sld [smem:[#allocation2 + $0x1d]]  ;;  %v1787_v34 = vstv %s1303_s13 }
  0x37   : > { %s1324_s26 = sld [smem:[#allocation2 + $0x26]]  ;;  %v1789_v35 = vstv %s1312_s14 }
  0x38   : > { %1332 = vmatmul.msk.f32.gmra.mxu0 %vm306_vm0, %v303_v7  ;;  %s1284_s30 = sld [smem:[#allocation2 + $0x7]]  ;;  %v1791_v36 = vstv %s1321_s15 }
  0x39   : > { %1336 = vmatmul.msk.f32.gmra.mxu1 %vm306_vm0, %v303_v7  ;;  %1340 = vmatmul.msk.f32.gmra.mxu2 %vm306_vm0, %v303_v7  ;;  %s1292_s0 = sld [smem:[#allocation2 + $0x10]]  ;;  %v1793_v37 = vstv %s1289_s16 }
  0x3a   : > { %s1301_s1 = sld [smem:[#allocation2 + $0x19]]  ;;  %v1795_v38 = vstv %s1297_s17 }
  0x3b   : > { %s1310_s2 = sld [smem:[#allocation2 + $0x22]]  ;;  %v1797_v40 = vstv %s1306_s23 }
  0x3c   : > { %s1319_s3 = sld [smem:[#allocation2 + $0x2b]]  ;;  %v1799_v41 = vstv %s1315_s25 }
  0x3d   : > { %s1287_s4 = sld [smem:[#allocation2 + $0x4]]  ;;  %v1801_v42 = vstv %s1324_s26 }
  0x3e   : > { %s1295_s27 = sld [smem:[#allocation2 + $0xd]]  ;;  %v1803_v43 = vstv %s1284_s30 }
  0x3f   : > { %s1304_s20 = sld [smem:[#allocation2 + $0x16]]  ;;  %v1805_v44 = vstv %s1292_s0 }
  0x40   : > { %s1313_s24 = sld [smem:[#allocation2 + $0x1f]]  ;;  %v1807_v45 = vstv %s1301_s1 }
  0x41   : > { %s1771_s29 = sld [smem:[#allocation2 + $0x28]]  ;;  %v1809_v46 = vstv %s1310_s2 }
  0x42   : > { %v1811_v47 = vstv %s1319_s3  ;;  %s1924_s0 = sld [smem:[#allocation2 + $0x1]] }
  0x43   : > { %v1813_v48 = vstv %s1287_s4  ;;  %s1932_s1 = sld [smem:[#allocation2 + $0xa]] }
  0x44   : > { %v1815_v49 = vstv %s1295_s27  ;;  %s1944_s2 = sld [smem:[#allocation2 + $0x13]] }
  0x45   : > { %v1817_v50 = vstv %s1304_s20  ;;  %s1954_s3 = sld [smem:[#allocation2 + $0x1c]] }
  0x46   : > { %v1819_v51 = vstv %s1313_s24  ;;  %s1959_s4 = sld [smem:[#allocation2 + $0x25]] }
  0x47   : > { %v1829_v60 = vstv %s1771_s29  ;;  %s1964_s20 = sld [smem:[#allocation2 + $0x6]] }
  0x48   : > { %2409 = vst [vmem:[#allocation15_spill] sm:$0xff] %v1829_v60  ;;  %s1969_s24 = sld [smem:[#allocation2 + $0xf]] }
  0x49   : > { %s1973_s27 = sld [smem:[#allocation2 + $0x18]] }
  0x4a   : > { %s1978_s29 = sld [smem:[#allocation2 + $0x21]] }
  0x4b   : > { %s1984_s6 = sld [smem:[#allocation2 + $0x2a]] }
  0x4c   : > { %s1993_s7 = sld [smem:[#allocation2 + $0x3]] }
  0x4d   : > { %s2002_s8 = sld [smem:[#allocation2 + $0xc]] }
  0x4e   : > { %s2014_s9 = sld [smem:[#allocation2 + $0x15]] }
  0x4f   : > { %s2024_s10 = sld [smem:[#allocation2 + $0x1e]] }
  0x50   : > { %s2038_s11 = sld [smem:[#allocation2 + $0x27]] }
  0x51   : > { %s2127_s12 = sld [smem:[#allocation2]] }
  0x52   : > { %s2131_s13 = sld [smem:[#allocation2 + $0x9]] }
  0x53   : > { %s2141_s14 = sld [smem:[#allocation2 + $0x12]] }
  0x54   : > { %s2153_s15 = sld [smem:[#allocation2 + $0x1b]] }
  0x55   : > { %s2164_s16 = sld [smem:[#allocation2 + $0x24]] }
  0x56   : > { %s2170_s17 = sld [smem:[#allocation5]] }
  0x57   : > { %s2176_s23 = sld [smem:[#allocation5 + $0x1]] }
  0x58   : > { %s2178_s25 = sld [smem:[#allocation5 + $0x2]] }
  0x59   : > { %s2183_s26 = sld [smem:[#allocation5 + $0x3]] }
  0x5a   : > { %s2187_s30 = sld [smem:[#allocation5 + $0x4]] }
  0xad   : > { %v330_v8 = vpop.f32.mrf.mxu0 }
  0xae   : > { %v356_v9 = vpop.f32.mrf.mxu1 }
  0xb4   : > { %v382_v10 = vpop.f32.mrf.mxu2 }
  0xb5   : > { %v333_v11 = vpop.f32.mrf.mxu0 }
  0xb6   : > { %v359_v12 = vpop.f32.mrf.mxu1  ;;  %418 = vmatpush.msrb.mxu0 %v333_v11  ;;  %1404 = vmatpush.msra.mxu3 %v333_v11 }
  0xb7   : > { %580 = vmatpush.msrb.mxu1 %v333_v11  ;;  %654 = vmatpush.msrb.mxu2 %v359_v12 }
  0xb8   : > { %419 = vmatpush.msrb.mxu0 %v330_v8  ;;  %1405 = vmatpush.msra.mxu3 %v330_v8 }
  0xb9   : > { %581 = vmatpush.msrb.mxu1 %v330_v8  ;;  %655 = vmatpush.msrb.mxu2 %v356_v9 }
  0xba   : > { %1341 = vmatmul.msk.f32.vlgmr.msrb.gmra.mxu0 %vm306_vm0, %v388_v13  ;;  %1342 = vmatmul.msk.f32.vlgmr.msra.gmra.mxu3 %vm306_vm0, %v389_v14 }
  0xbb   : > { %489 = vmatpush.msra.mxu0 %v333_v11  ;;  %728 = vmatpush.msrb.mxu3 %v359_v12 }
  0xbc   : > { %1361 = vmatmul.msk.f32.vlgmr.msrb.gmra.mxu2 %vm306_vm0, %v388_v13  ;;  %1357 = vmatmul.msk.f32.vlgmr.msrb.gmra.mxu1 %vm306_vm0, %v1353_v15  ;;  %v385_v16 = vpop.f32.mrf.mxu2 }
  0xbd   : > { %490 = vmatpush.msra.mxu0 %v330_v8  ;;  %729 = vmatpush.msrb.mxu3 %v356_v9 }
  0xbe   : > { %876 = vmatpush.msra.mxu1 %v385_v16  ;;  %950 = vmatpush.msra.mxu2 %v385_v16 }
  0xbf   : > { %802 = vmatpush.msrb.mxu0 %v359_v12  ;;  %1024 = vmatpush.msra.mxu3 %v385_v16 }
  0xc0   : > { %877 = vmatpush.msra.mxu1 %v382_v10  ;;  %951 = vmatpush.msra.mxu2 %v382_v10 }
  0xc1   : > { %803 = vmatpush.msrb.mxu0 %v356_v9  ;;  %1025 = vmatpush.msra.mxu3 %v382_v10 }
  0xc2   : > { %1343 = vmatmul.msk.f32.gmra.mxu3 %vm306_vm0, %v390_v17  ;;  %1349 = vmatmul.msk.f32.vlgmr.msra.gmra.mxu0 %vm306_vm0, %v1345_v18 }
  0xc4   : > { %1362 = vmatmul.msk.f32.gmra.mxu2 %vm306_vm0, %v389_v14  ;;  %1358 = vmatmul.msk.f32.gmra.mxu1 %vm306_vm0, %v1354_v19 }
  0xca   : > { %1344 = vmatmul.msk.f32.gmra.mxu3 %vm306_vm0, %v391_v20  ;;  %1350 = vmatmul.msk.f32.gmra.mxu0 %vm306_vm0, %v1346_v21 }
  0xcc   : > { %1363 = vmatmul.msk.f32.gmra.mxu2 %vm306_vm0, %v390_v17  ;;  %1359 = vmatmul.msk.f32.gmra.mxu1 %vm306_vm0, %v1355_v22 }
  0xd2   : > { %1351 = vmatmul.msk.f32.gmra.mxu0 %vm306_vm0, %v1347_v23  ;;  %1365 = vmatmul.msk.f32.vlgmr.msrb.gmra.mxu3 %vm306_vm0, %v1345_v18 }
  0xd4   : > { %1364 = vmatmul.msk.f32.gmra.mxu2 %vm306_vm0, %v391_v20  ;;  %1360 = vmatmul.msk.f32.gmra.mxu1 %vm306_vm0, %v1356_v24 }
  0xda   : > { %1352 = vmatmul.msk.f32.gmra.mxu0 %vm306_vm0, %v1348_v25  ;;  %1366 = vmatmul.msk.f32.gmra.mxu3 %vm306_vm0, %v1346_v21 }
  0xdc   : > { %1377 = vmatmul.msk.f32.vlgmr.msra.gmra.mxu2 %vm306_vm0, %v1345_v18  ;;  %1373 = vmatmul.msk.f32.vlgmr.msra.gmra.mxu1 %vm306_vm0, %v388_v13 }
  0xe2   : > { %1367 = vmatmul.msk.f32.gmra.mxu3 %vm306_vm0, %v1347_v23  ;;  %1369 = vmatmul.msk.f32.vlgmr.msrb.gmra.mxu0 %vm306_vm0, %v1353_v15 }
  0xe4   : > { %1378 = vmatmul.msk.f32.gmra.mxu2 %vm306_vm0, %v1346_v21  ;;  %1374 = vmatmul.msk.f32.gmra.mxu1 %vm306_vm0, %v389_v14 }
  0xea   : > { %1368 = vmatmul.msk.f32.gmra.mxu3 %vm306_vm0, %v1348_v25  ;;  %1370 = vmatmul.msk.f32.gmra.mxu0 %vm306_vm0, %v1354_v19 }
  0xec   : > { %1379 = vmatmul.msk.f32.gmra.mxu2 %vm306_vm0, %v1347_v23  ;;  %1375 = vmatmul.msk.f32.gmra.mxu1 %vm306_vm0, %v390_v17 }
  0xf2   : > { %1371 = vmatmul.msk.f32.gmra.mxu0 %vm306_vm0, %v1355_v22  ;;  %1381 = vmatmul.msk.f32.vlgmr.msra.gmra.mxu3 %vm306_vm0, %v1353_v15 }
  0xf4   : > { %1380 = vmatmul.msk.f32.gmra.mxu2 %vm306_vm0, %v1348_v25  ;;  %1376 = vmatmul.msk.f32.gmra.mxu1 %vm306_vm0, %v391_v20 }
  0xfa   : > { %1372 = vmatmul.msk.f32.gmra.mxu0 %vm306_vm0, %v1356_v24  ;;  %1382 = vmatmul.msk.f32.gmra.mxu3 %vm306_vm0, %v1354_v19 }
 0x102   : > { %1383 = vmatmul.msk.f32.gmra.mxu3 %vm306_vm0, %v1355_v22 }
 0x10a   : > { %1384 = vmatmul.msk.f32.gmra.mxu3 %vm306_vm0, %v1356_v24 }
 0x137   : > { %v421_v30 = vpop.f32.mrf.mxu0 }
 0x138   : > { %v434_v52 = vmul.f32 %v1773_v26, %v421_v30  ;;  %v439_v53 = vmul.f32 %v1775_v27, %v421_v30  ;;  %v444_v54 = vmul.f32 %v1777_v28, %v421_v30  ;;  %v449_v55 = vmul.f32 %v1779_v29, %v421_v30 }
 0x139   : > { %v583_v39 = vpop.f32.mrf.mxu1  ;;  %v454_v56 = vmul.f32 %v1781_v31, %v421_v30 }
 0x13a   : > { %v596_v58 = vmul.f32 %v1793_v37, %v583_v39  ;;  %v605_v59 = vmul.f32 %v1795_v38, %v583_v39  ;;  %v614_v62 = vmul.f32 %v1797_v40, %v583_v39  ;;  %v623_v63 = vmul.f32 %v1799_v41, %v583_v39 }
 0x13b   : > { %v632_v0 = vmul.f32 %v1801_v42, %v583_v39 }
 0x13d   : > { %v424_v57 = vpop.f32.mrf.mxu3 }
 0x13e   : > { %v435_v61 = vmul.f32 %v1773_v26, %v424_v57  ;;  %v440_v1 = vmul.f32 %v1775_v27, %v424_v57  ;;  %v445_v2 = vmul.f32 %v1777_v28, %v424_v57  ;;  %v450_v3 = vmul.f32 %v1779_v29, %v424_v57 }
 0x13f   : > { %v455_v4 = vmul.f32 %v1781_v31, %v424_v57  ;;  %v492_v5 = vpop.f32.mrf.mxu0  ;;  %v657_v6 = vpop.f32.mrf.mxu2 }
 0x140   : > { %v505_v7 = vmul.f32 %v1783_v32, %v492_v5  ;;  %v514_v8 = vmul.f32 %v1785_v33, %v492_v5  ;;  %v523_v9 = vmul.f32 %v1787_v34, %v492_v5  ;;  %v532_v10 = vmul.f32 %v1789_v35, %v492_v5 }
 0x141   : > { %v541_v11 = vmul.f32 %v1791_v36, %v492_v5  ;;  %v670_v12 = vmul.f32 %v1803_v43, %v657_v6  ;;  %v679_v13 = vmul.f32 %v1805_v44, %v657_v6  ;;  %v688_v14 = vmul.f32 %v1807_v45, %v657_v6  ;;  %v586_v15 = vpop.f32.mrf.mxu1 }
 0x142   : > { %v509_v16 = vadd.f32 %v505_v7, %v434_v52  ;;  %v518_v17 = vadd.f32 %v514_v8, %v439_v53  ;;  %v527_v18 = vadd.f32 %v523_v9, %v444_v54  ;;  %v536_v19 = vadd.f32 %v532_v10, %v449_v55 }
 0x143   : > { %v545_v20 = vadd.f32 %v541_v11, %v454_v56  ;;  %v697_v21 = vmul.f32 %v1809_v46, %v657_v6  ;;  %v706_v22 = vmul.f32 %v1811_v47, %v657_v6  ;;  %v597_v23 = vmul.f32 %v1793_v37, %v586_v15 }
 0x144   : > { %v600_v24 = vadd.f32 %v596_v58, %v509_v16  ;;  %v609_v25 = vadd.f32 %v605_v59, %v518_v17  ;;  %v618_v30 = vadd.f32 %v614_v62, %v527_v18  ;;  %v627_v39 = vadd.f32 %v623_v63, %v536_v19 }
 0x145   : > { %v636_v57 = vadd.f32 %v632_v0, %v545_v20  ;;  %v427_v5 = vpop.f32.mrf.mxu3  ;;  %v606_v60 = vmul.f32 %v1795_v38, %v586_v15  ;;  %v615_v52 = vmul.f32 %v1797_v40, %v586_v15  ;;  %v624_v53 = vmul.f32 %v1799_v41, %v586_v15 }
 0x146   : > { %v1853_v54 = vadd.f32 %v670_v12, %v600_v24  ;;  %v1855_v55 = vadd.f32 %v679_v13, %v609_v25  ;;  %v1857_v56 = vadd.f32 %v688_v14, %v618_v30  ;;  %v1859_v6 = vadd.f32 %v697_v21, %v627_v39 }
 0x147   : > { %v1861_v58 = vadd.f32 %v706_v22, %v636_v57  ;;  %v436_v59 = vmul.f32 %v1773_v26, %v427_v5  ;;  %v441_v62 = vmul.f32 %v1775_v27, %v427_v5  ;;  %v446_v63 = vmul.f32 %v1777_v28, %v427_v5  ;;  %v495_v0 = vpop.f32.mrf.mxu0  ;;  %v660_v7 = vpop.f32.mrf.mxu2 }
 0x148   : > { %2410 = vst [vmem:[#allocation16_spill] sm:$0xff] %v1859_v6  ;;  %v451_v8 = vmul.f32 %v1779_v29, %v427_v5  ;;  %v456_v9 = vmul.f32 %v1781_v31, %v427_v5  ;;  %v506_v10 = vmul.f32 %v1783_v32, %v495_v0  ;;  %v515_v11 = vmul.f32 %v1785_v33, %v495_v0 }
 0x149   : > { %2411 = vst [vmem:[#allocation17_spill] sm:$0xff] %v1861_v58  ;;  %v524_v12 = vmul.f32 %v1787_v34, %v495_v0  ;;  %v533_v13 = vmul.f32 %v1789_v35, %v495_v0  ;;  %v542_v14 = vmul.f32 %v1791_v36, %v495_v0  ;;  %v633_v16 = vmul.f32 %v1801_v42, %v586_v15  ;;  %v589_v21 = vpop.f32.mrf.mxu1 }
 0x14a   : > { %v510_v17 = vadd.f32 %v506_v10, %v435_v61  ;;  %v519_v18 = vadd.f32 %v515_v11, %v440_v1  ;;  %v671_v19 = vmul.f32 %v1803_v43, %v660_v7  ;;  %v680_v20 = vmul.f32 %v1805_v44, %v660_v7 }
 0x14b   : > { %v528_v22 = vadd.f32 %v524_v12, %v445_v2  ;;  %v537_v24 = vadd.f32 %v533_v13, %v450_v3  ;;  %v546_v25 = vadd.f32 %v542_v14, %v455_v4  ;;  %v689_v30 = vmul.f32 %v1807_v45, %v660_v7 }
 0x14c   : > { %v601_v39 = vadd.f32 %v597_v23, %v510_v17  ;;  %v610_v57 = vadd.f32 %v606_v60, %v519_v18  ;;  %v698_v5 = vmul.f32 %v1809_v46, %v660_v7  ;;  %v707_v0 = vmul.f32 %v1811_v47, %v660_v7 }
 0x14d   : > { %v619_v58 = vadd.f32 %v615_v52, %v528_v22  ;;  %v628_v15 = vadd.f32 %v624_v53, %v537_v24  ;;  %v637_v61 = vadd.f32 %v633_v16, %v546_v25  ;;  %v430_v1 = vpop.f32.mrf.mxu3  ;;  %v598_v10 = vmul.f32 %v1793_v37, %v589_v21 }
 0x14e   : > { %v1880_v11 = vadd.f32 %v671_v19, %v601_v39  ;;  %v1882_v6 = vadd.f32 %v680_v20, %v610_v57  ;;  %v437_v2 = vmul.f32 %v1773_v26, %v430_v1  ;;  %v1886_v3 = vmul.f32 %v1775_v27, %v430_v1 }
 0x14f   : > { %v1888_v60 = vadd.f32 %v689_v30, %v619_v58  ;;  %v1890_v4 = vadd.f32 %v698_v5, %v628_v15  ;;  %v1892_v23 = vadd.f32 %v707_v0, %v637_v61  ;;  %v447_v52 = vmul.f32 %v1777_v28, %v430_v1  ;;  %v498_v53 = vpop.f32.mrf.mxu0  ;;  %v663_v28 = vpop.f32.mrf.mxu2 }
 0x150   : > { %v1896_v7 = vmul.f32 %v1779_v29, %v430_v1  ;;  %v1899_v12 = vmul.f32 %v1781_v31, %v430_v1  ;;  %v507_v26 = vmul.f32 %v1783_v32, %v498_v53  ;;  %v516_v27 = vmul.f32 %v1785_v33, %v498_v53 }
 0x151   : > { %v525_v58 = vmul.f32 %v1787_v34, %v498_v53  ;;  %v534_v13 = vmul.f32 %v1789_v35, %v498_v53  ;;  %v543_v14 = vmul.f32 %v1791_v36, %v498_v53  ;;  %v607_v16 = vmul.f32 %v1795_v38, %v589_v21 }
 0x152   : > { %v511_v17 = vadd.f32 %v507_v26, %v436_v59  ;;  %v520_v18 = vadd.f32 %v516_v27, %v441_v62  ;;  %v616_v29 = vmul.f32 %v1797_v40, %v589_v21  ;;  %v625_v31 = vmul.f32 %v1799_v41, %v589_v21 }
 0x153   : > { %v529_v19 = vadd.f32 %v525_v58, %v446_v63  ;;  %v538_v20 = vadd.f32 %v534_v13, %v451_v8  ;;  %v547_v22 = vadd.f32 %v543_v14, %v456_v9  ;;  %v634_v24 = vmul.f32 %v1801_v42, %v589_v21  ;;  %v2412_v14 = vld [vmem:[#allocation15_spill] sm:$0xff] }
 0x154   : > { %v602_v25 = vadd.f32 %v598_v10, %v511_v17  ;;  %v611_v30 = vadd.f32 %v607_v16, %v520_v18  ;;  %v672_v39 = vmul.f32 %v1803_v43, %v663_v28  ;;  %v681_v57 = vmul.f32 %v1805_v44, %v663_v28 }
 0x155   : > { %v620_v5 = vadd.f32 %v616_v29, %v529_v19  ;;  %v629_v0 = vadd.f32 %v625_v31, %v538_v20  ;;  %v638_v15 = vadd.f32 %v634_v24, %v547_v22  ;;  %v690_v59 = vmul.f32 %v1807_v45, %v663_v28  ;;  %v731_v62 = vpop.f32.mrf.mxu3  ;;  %v2413_v19 = vld [vmem:[#allocation16_spill] sm:$0xff]  ;;  %v2414_v22 = vld [vmem:[#allocation17_spill] sm:$0xff] }
 0x156   : > { %v1913_v61 = vadd.f32 %v672_v39, %v602_v25  ;;  %v1915_v1 = vadd.f32 %v681_v57, %v611_v30  ;;  %v699_v63 = vmul.f32 %v1809_v46, %v663_v28  ;;  %v708_v8 = vmul.f32 %v1811_v47, %v663_v28  ;;  %v592_v28 = vpop.f32.mrf.mxu1 }
 0x157   : > { %v1919_v9 = vadd.f32 %v690_v59, %v620_v5  ;;  %v744_v21 = vmul.f32 %v1813_v48, %v731_v62  ;;  %v753_v10 = vmul.f32 %v1815_v49, %v731_v62  ;;  %v762_v53 = vmul.f32 %v1817_v50, %v731_v62  ;;  %v501_v26 = vpop.f32.mrf.mxu0  ;;  %v666_v39 = vpop.f32.mrf.mxu2 }
 0x158   : > { %v1926_v27 = vadd.f32 %v699_v63, %v629_v0  ;;  %v1928_v58 = vadd.f32 %v708_v8, %v638_v15  ;;  %v771_v13 = vmul.f32 %v1819_v51, %v731_v62  ;;  %v780_v16 = vmul.f32 %v2412_v14, %v731_v62 }
 0x159   : > { %v1935_v17 = vadd.f32 %v744_v21, %v1853_v54  ;;  %v1938_v18 = vadd.f32 %v753_v10, %v1855_v55  ;;  %v1941_v29 = vadd.f32 %v762_v53, %v1857_v56  ;;  %v508_v31 = vmul.f32 %v1783_v32, %v501_v26 }
 0x15a   : > { %v1947_v20 = vadd.f32 %v771_v13, %v2413_v19  ;;  %v1950_v24 = vadd.f32 %v780_v16, %v2414_v22  ;;  %v517_v25 = vmul.f32 %v1785_v33, %v501_v26  ;;  %v526_v54 = vmul.f32 %v1787_v34, %v501_v26 }
 0x15b   : > { %v512_v55 = vadd.f32 %v508_v31, %v437_v2  ;;  %v535_v56 = vmul.f32 %v1789_v35, %v501_v26  ;;  %v544_v30 = vmul.f32 %v1791_v36, %v501_v26  ;;  %v599_v32 = vmul.f32 %v1793_v37, %v592_v28 }
 0x15c   : > { %v521_v57 = vadd.f32 %v517_v25, %v1886_v3  ;;  %v530_v5 = vadd.f32 %v526_v54, %v447_v52  ;;  %v608_v0 = vmul.f32 %v1795_v38, %v592_v28  ;;  %v617_v33 = vmul.f32 %v1797_v40, %v592_v28 }
 0x15d   : > { %v539_v34 = vadd.f32 %v535_v56, %v1896_v7  ;;  %v548_v35 = vadd.f32 %v544_v30, %v1899_v12  ;;  %v603_v2 = vadd.f32 %v599_v32, %v512_v55  ;;  %v626_v36 = vmul.f32 %v1799_v41, %v592_v28  ;;  %v734_v37 = vpop.f32.mrf.mxu3 }
 0x15e   : > { %v612_v15 = vadd.f32 %v608_v0, %v521_v57  ;;  %v621_v59 = vadd.f32 %v617_v33, %v530_v5  ;;  %v635_v3 = vmul.f32 %v1801_v42, %v592_v28  ;;  %v673_v38 = vmul.f32 %v1803_v43, %v666_v39  ;;  %v879_v55 = vpop.f32.mrf.mxu1 }
 0x15f   : > { %v630_v40 = vadd.f32 %v626_v36, %v539_v34  ;;  %v682_v52 = vmul.f32 %v1805_v44, %v666_v39  ;;  %v691_v7 = vmul.f32 %v1807_v45, %v666_v39  ;;  %v700_v12 = vmul.f32 %v1809_v46, %v666_v39  ;;  %v805_v8 = vpop.f32.mrf.mxu0  ;;  %v953_v0 = vpop.f32.mrf.mxu2 }
 0x160   : > { %v639_v41 = vadd.f32 %v635_v3, %v548_v35  ;;  %v1980_v62 = vadd.f32 %v673_v38, %v603_v2  ;;  %v709_v63 = vmul.f32 %v1811_v47, %v666_v39  ;;  %v745_v42 = vmul.f32 %v1813_v48, %v734_v37 }
 0x161   : > { %v1986_v43 = vadd.f32 %v682_v52, %v612_v15  ;;  %v1988_v44 = vadd.f32 %v691_v7, %v621_v59  ;;  %v1990_v45 = vadd.f32 %v700_v12, %v630_v40  ;;  %v754_v46 = vmul.f32 %v1815_v49, %v734_v37 }
 0x162   : > { %v1995_v21 = vadd.f32 %v709_v63, %v639_v41  ;;  %v1998_v47 = vadd.f32 %v745_v42, %v1880_v11  ;;  %v763_v10 = vmul.f32 %v1817_v50, %v734_v37  ;;  %v772_v53 = vmul.f32 %v1819_v51, %v734_v37 }
 0x163   : > { %v2005_v26 = vadd.f32 %v754_v46, %v1882_v6  ;;  %v781_v13 = vmul.f32 %v2412_v14, %v734_v37  ;;  %v2009_v16 = vstv %s1924_s0  ;;  %v2012_v28 = vstv %s1932_s1  ;;  %s243_s0 = sand.u32 1, %s1562_s19  }
 0x164   : > { %v2017_v11 = vadd.f32 %v763_v10, %v1888_v60  ;;  %v2020_v31 = vadd.f32 %v772_v53, %v1890_v4  ;;  %v818_v19 = vmul.f32 %v2009_v16, %v805_v8  ;;  %v827_v6 = vmul.f32 %v2012_v28, %v805_v8  ;;  %s2227_s1 = smul.u32 160, %s243_s0 }
 0x165   : > { %v2027_v22 = vadd.f32 %v781_v13, %v1892_v23  ;;  %v2030_v25 = vstv %s1944_s2  ;;  %v2033_v54 = vstv %s1954_s3  ;;  %v2036_v60 = vstv %s1959_s4  ;;  %v737_v15 = vpop.f32.mrf.mxu3  ;;  %s1407_s3 = smul.u32 160, %s1627_s22 }
 0x166   : > { %v822_v4 = vadd.f32 %v818_v19, %v1935_v17  ;;  %v831_v56 = vadd.f32 %v827_v6, %v1938_v18  ;;  %v836_v30 = vmul.f32 %v2030_v25, %v805_v8  ;;  %v845_v23 = vmul.f32 %v2033_v54, %v805_v8  ;;  %s2263_s2 = scalar_lea.vmem [#allocation7], %s2227_s1 }
 0x167   : > { %v854_v32 = vmul.f32 %v2036_v60, %v805_v8  ;;  %v2046_v39 = vstv %s1964_s20  ;;  %v2049_v57 = vstv %s1969_s24  ;;  %v2052_v5 = vstv %s1973_s27  ;;  %v808_v53 = vpop.f32.mrf.mxu0  ;;  %s1185_s20 = scalar_lea.hbm %s2387_s5, %s1407_s3  ;;  %s1186_s24 = sshll.u32 %s2263_s2, 4  ;;  %s1187_s24 = int_to_ptr.vmem [resolvable:$true] %s1186_s24 }
 0x168   : > { %v840_v17 = vadd.f32 %v836_v30, %v1941_v29  ;;  %v849_v18 = vadd.f32 %v845_v23, %v1947_v20  ;;  %v892_v33 = vmul.f32 %v2046_v39, %v879_v55  ;;  %v901_v34 = vmul.f32 %v2049_v57, %v879_v55  ;;  %s1188_s27 = sshll.u32 %s1185_s20, 4  ;;  %s1189_s27 = int_to_ptr.hbm [resolvable:$true] %s1188_s27 }
 0x169   : > { %v858_v35 = vadd.f32 %v854_v32, %v1950_v24  ;;  %v910_v2 = vmul.f32 %v2052_v5, %v879_v55  ;;  %v2061_v36 = vstv %s1978_s29  ;;  %v2064_v37 = vstv %s1984_s6  ;;  %v882_v32 = vpop.f32.mrf.mxu1  ;;  %s1174_s29 = scalar_lea.sflag [#allocation3], %s243_s0  ;;  %s1514_s6 = sshra.s32 %s1189_s27, 4  ;;  %s1515_s6 = int_to_ptr.hbm [resolvable:$true] %s1514_s6 }
 0x16a   : > { %v896_v59 = vadd.f32 %v892_v33, %v822_v4  ;;  %v905_v29 = vadd.f32 %v901_v34, %v831_v56  ;;  %v919_v3 = vmul.f32 %v2061_v36, %v879_v55  ;;  %v928_v20 = vmul.f32 %v2064_v37, %v879_v55  ;;  %p1521_p3 = scmp.lt.s32.totalorder %s1515_s6, %s2387_s5 }
 0x16b   : > { %v914_v38 = vadd.f32 %v910_v2, %v840_v17  ;;  %v2069_v40 = vstv %s1993_s7  ;;  %v2072_v52 = vstv %s2002_s8  ;;  %v2075_v24 = vstv %s2014_s9  ;;  %s1516_s7 = scalar_lea.hbm %s1515_s6, 160 }
 0x16c   : > { %v923_v7 = vadd.f32 %v919_v3, %v849_v18  ;;  %v932_v12 = vadd.f32 %v928_v20, %v858_v35  ;;  %v966_v41 = vmul.f32 %v2069_v40, %v953_v0  ;;  %v975_v63 = vmul.f32 %v2072_v52, %v953_v0  ;;  %p1517_p0 = scmp.ne.s32.totalorder %s1515_s6, %s1516_s7 }
 0x16d   : > { %v984_v42 = vmul.f32 %v2075_v24, %v953_v0  ;;  %v2081_v46 = vstv %s2024_s10  ;;  %v2084_v8 = vstv %s2038_s11  ;;  %v746_v10 = vmul.f32 %v1813_v48, %v737_v15  ;;  %s1520_s10 = scalar_lea.hbm %s2387_s5, 320 }
 0x16e   : > { %v2087_v13 = vadd.f32 %v966_v41, %v896_v59  ;;  %v2089_v19 = vadd.f32 %v975_v63, %v905_v29  ;;  %v993_v6 = vmul.f32 %v2081_v46, %v953_v0  ;;  %v1002_v55 = vmul.f32 %v2084_v8, %v953_v0  ;;  %v956_v59 = vpop.f32.mrf.mxu2  ;;  %p1518_p1 = pnand %p1517_p0, %p1644_p5  ;;  %p1522_p4 = scmp.lt.s32.totalorder %s1520_s10, %s1516_s7 }
 0x16f   : > { %v2093_v4 = vadd.f32 %v984_v42, %v914_v38  ;;  %v2096_v56 = vadd.f32 %v746_v10, %v1913_v61  ;;  %v755_v30 = vmul.f32 %v1815_v49, %v737_v15  ;;  %v764_v23 = vmul.f32 %v1817_v50, %v737_v15 }
 0x170   : > { %v2100_v17 = vadd.f32 %v993_v6, %v923_v7  ;;  %v2102_v18 = vadd.f32 %v1002_v55, %v932_v12  ;;  %v773_v33 = vmul.f32 %v1819_v51, %v737_v15  ;;  %v782_v34 = vmul.f32 %v2412_v14, %v737_v15  ;;  %v740_v12 = vpop.f32.mrf.mxu3  ;;  %p1519_p2 = pneg %p1518_p1  ;;  %p1523_p7 = por %p1522_p4, %p1521_p3 }
 0x171   : > { %v759_v0 = vadd.f32 %v755_v30, %v1915_v1  ;;  %v768_v35 = vadd.f32 %v764_v23, %v1919_v9  ;;  %v819_v61 = vmul.f32 %v2009_v16, %v808_v53  ;;  %v828_v2 = vmul.f32 %v2012_v28, %v808_v53 }
 0x172   : > { %v777_v29 = vadd.f32 %v773_v33, %v1926_v27  ;;  %v786_v3 = vadd.f32 %v782_v34, %v1928_v58  ;;  %v837_v20 = vmul.f32 %v2030_v25, %v808_v53  ;;  %v846_v38 = vmul.f32 %v2033_v54, %v808_v53  ;;  %p1524_p8 = pnand %p1523_p7, %p1519_p2 }
 0x173   : > { %v823_v7 = vadd.f32 %v819_v61, %v1998_v47  ;;  %v832_v15 = vadd.f32 %v828_v2, %v2005_v26  ;;  %v855_v1 = vmul.f32 %v2036_v60, %v808_v53  ;;  %v893_v9 = vmul.f32 %v2046_v39, %v882_v32 }
 0x174   : > { %v841_v41 = vadd.f32 %v837_v20, %v2017_v11  ;;  %v850_v63 = vadd.f32 %v846_v38, %v2020_v31  ;;  %v902_v27 = vmul.f32 %v2049_v57, %v882_v32  ;;  %v911_v58 = vmul.f32 %v2052_v5, %v882_v32 }
 0x175   : > { %v859_v42 = vadd.f32 %v855_v1, %v2027_v22  ;;  %v897_v10 = vadd.f32 %v893_v9, %v823_v7  ;;  %v920_v47 = vmul.f32 %v2061_v36, %v882_v32  ;;  %v929_v26 = vmul.f32 %v2064_v37, %v882_v32  ;;  %v811_v22 = vpop.f32.mrf.mxu0  ;;  %v885_v1 = vpop.f32.mrf.mxu1 }
 0x176   : > { %v906_v6 = vadd.f32 %v902_v27, %v832_v15  ;;  %v915_v53 = vadd.f32 %v911_v58, %v841_v41  ;;  %v967_v55 = vmul.f32 %v2069_v40, %v956_v59  ;;  %v976_v30 = vmul.f32 %v2072_v52, %v956_v59  ;;  %v959_v58 = vpop.f32.mrf.mxu2 }
 0x177   : > { %v924_v11 = vadd.f32 %v920_v47, %v850_v63  ;;  %v933_v31 = vadd.f32 %v929_v26, %v859_v42  ;;  %v985_v23 = vmul.f32 %v2075_v24, %v956_v59  ;;  %v994_v33 = vmul.f32 %v2081_v46, %v956_v59 }
 0x178   : > { %v2133_v34 = vadd.f32 %v967_v55, %v897_v10  ;;  %v2135_v32 = vadd.f32 %v976_v30, %v906_v6  ;;  %v1003_v61 = vmul.f32 %v2084_v8, %v956_v59  ;;  %v2139_v2 = vmul.f32 %v1813_v48, %v740_v12 }
 0x179   : > { %v2143_v20 = vadd.f32 %v985_v23, %v915_v53  ;;  %v2145_v38 = vadd.f32 %v994_v33, %v924_v11  ;;  %v2148_v7 = vmul.f32 %v1815_v49, %v740_v12  ;;  %v2151_v15 = vmul.f32 %v1817_v50, %v740_v12  ;;  %v1027_v53 = vpop.f32.mrf.mxu3 }
 0x17a   : > { %v2155_v9 = vadd.f32 %v1003_v61, %v933_v31  ;;  %v2158_v48 = vmul.f32 %v1819_v51, %v740_v12  ;;  %v2161_v59 = vmul.f32 %v2412_v14, %v740_v12  ;;  %v820_v41 = vmul.f32 %v2009_v16, %v811_v22 }
 0x17b   : > { %v829_v49 = vmul.f32 %v2012_v28, %v811_v22  ;;  %v838_v50 = vmul.f32 %v2030_v25, %v811_v22  ;;  %v847_v63 = vmul.f32 %v2033_v54, %v811_v22  ;;  %v856_v27 = vmul.f32 %v2036_v60, %v811_v22 }
 0x17c   : > { %v824_v51 = vadd.f32 %v820_v41, %v2096_v56  ;;  %v894_v14 = vmul.f32 %v2046_v39, %v885_v1  ;;  %v903_v12 = vmul.f32 %v2049_v57, %v885_v1  ;;  %v912_v42 = vmul.f32 %v2052_v5, %v885_v1 }
 0x17d   : > { %v833_v10 = vadd.f32 %v829_v49, %v759_v0  ;;  %v842_v47 = vadd.f32 %v838_v50, %v768_v35  ;;  %v851_v26 = vadd.f32 %v847_v63, %v777_v29  ;;  %v860_v6 = vadd.f32 %v856_v27, %v786_v3 }
 0x17e   : > { %v898_v55 = vadd.f32 %v894_v14, %v824_v51  ;;  %v921_v30 = vmul.f32 %v2061_v36, %v885_v1  ;;  %v930_v56 = vmul.f32 %v2064_v37, %v885_v1  ;;  %v968_v11 = vmul.f32 %v2069_v40, %v959_v58 }
 0x17f   : > { %v907_v31 = vadd.f32 %v903_v12, %v833_v10  ;;  %v916_v0 = vadd.f32 %v912_v42, %v842_v47  ;;  %v977_v35 = vmul.f32 %v2072_v52, %v959_v58  ;;  %v986_v29 = vmul.f32 %v2075_v24, %v959_v58 }
 0x180   : > { %v925_v3 = vadd.f32 %v921_v30, %v851_v26  ;;  %v934_v23 = vadd.f32 %v930_v56, %v860_v6  ;;  %v2189_v33 = vadd.f32 %v968_v11, %v898_v55  ;;  %v995_v22 = vmul.f32 %v2081_v46, %v959_v58 }
 0x181   : > { %v2192_v61 = vadd.f32 %v977_v35, %v907_v31  ;;  %v2194_v1 = vadd.f32 %v986_v29, %v916_v0  ;;  %v1004_v41 = vmul.f32 %v2084_v8, %v959_v58  ;;  %v2198_v49 = vstv %s2127_s12 }
 0x182   : > { %v2200_v50 = vadd.f32 %v995_v22, %v925_v3  ;;  %v1040_v63 = vmul.f32 %v2198_v49, %v1027_v53  ;;  %v2205_v27 = vstv %s2131_s13  ;;  %v2208_v51 = vstv %s2141_s14 }
 0x183   : > { %v2210_v14 = vadd.f32 %v1004_v41, %v934_v23  ;;  %v1049_v12 = vmul.f32 %v2205_v27, %v1027_v53  ;;  %v1058_v58 = vmul.f32 %v2208_v51, %v1027_v53  ;;  %v2215_v42 = vstv %s2153_s15 }
 0x184   : > { %v1044_v10 = vadd.f32 %v1040_v63, %v2087_v13  ;;  %v1067_v47 = vmul.f32 %v2215_v42, %v1027_v53  ;;  %v2220_v26 = vstv %s2164_s16  ;;  %v2223_v6 = vstv %s2170_s17  ;;  %v814_v63 = vpop.f32.mrf.mxu0 }
 0x185   : > { %v1053_v55 = vadd.f32 %v1049_v12, %v2089_v19  ;;  %v1062_v30 = vadd.f32 %v1058_v58, %v2093_v4  ;;  %v1076_v56 = vmul.f32 %v2220_v26, %v1027_v53  ;;  %v2233_v11 = vstv %s2176_s23  ;;  %v1030_v4 = vpop.f32.mrf.mxu3 }
 0x186   : > { %v1071_v13 = vadd.f32 %v1067_v47, %v2100_v17  ;;  %v1085_v31 = vadd.f32 %v2223_v6, %v1044_v10  ;;  %v2238_v0 = vstv %s2178_s25  ;;  %v2241_v35 = vstv %s2183_s26 }
 0x187   : > { %v1080_v29 = vadd.f32 %v1076_v56, %v2102_v18  ;;  %v1102_v3 = vadd.f32 %v2233_v11, %v1053_v55  ;;  %v1120_v19 = vadd.f32 %v2238_v0, %v1062_v30  ;;  %v2247_v23 = vstv %s2187_s30 }
 0x188   : > { %v1089_v53 = vmul.f32 0.43, %v1085_v31  ;;  %v1138_v22 = vadd.f32 %v2241_v35, %v1071_v13  ;;  %v751_v17 = vadd.f32 %v2139_v2, %v1980_v62  ;;  %v760_v41 = vadd.f32 %v2148_v7, %v1986_v43  ;;  %v888_v2 = vpop.f32.mrf.mxu1 }
 0x189   : > { %v1106_v12 = vmul.f32 0.43, %v1102_v3  ;;  %v1124_v18 = vmul.f32 0.43, %v1120_v19  ;;  %v1156_v58 = vadd.f32 %v2247_v23, %v1080_v29  ;;  %v769_v10 = vadd.f32 %v2151_v15, %v1988_v44  ;;  %v962_v29 = vpop.f32.mrf.mxu2 }
 0x18a   : > { %v1093_v47 = vmax.f32 %v1085_v31, %v1089_v53  ;;  %v1142_v55 = vmul.f32 0.43, %v1138_v22  ;;  %v778_v30 = vadd.f32 %v2158_v48, %v1990_v45  ;;  %v787_v62 = vadd.f32 %v2161_v59, %v1995_v21 }
 0x18b   : > { %v1110_v56 = vmax.f32 %v1102_v3, %v1106_v12  ;;  %v1128_v13 = vmax.f32 %v1120_v19, %v1124_v18  ;;  %v1160_v43 = vmul.f32 0.43, %v1156_v58  ;;  %v821_v7 = vmul.f32 %v2009_v16, %v814_v63 }
 0x18c   : > { %1097 = vst [vmem:[%s2263_s2] sm:$0xff] %v1093_v47  ;;  %v1146_v44 = vmax.f32 %v1138_v22, %v1142_v55  ;;  %v830_v15 = vmul.f32 %v2012_v28, %v814_v63  ;;  %v839_v45 = vmul.f32 %v2030_v25, %v814_v63  ;;  %v848_v21 = vmul.f32 %v2033_v54, %v814_v63 }
 0x18d   : > { %1385 = vst [vmem:[%s2263_s2 + $0x20] sm:$0xff] %v1110_v56  ;;  %v1164_v48 = vmax.f32 %v1156_v58, %v1160_v43  ;;  %v825_v59 = vadd.f32 %v821_v7, %v751_v17  ;;  %v857_v16 = vmul.f32 %v2036_v60, %v814_v63  ;;  %v895_v31 = vmul.f32 %v2046_v39, %v888_v2 }
 0x18e   : > { %1389 = vst [vmem:[%s2263_s2 + $0x40] sm:$0xff] %v1128_v13  ;;  %v834_v3 = vadd.f32 %v830_v15, %v760_v41  ;;  %v843_v19 = vadd.f32 %v839_v45, %v769_v10  ;;  %v852_v53 = vadd.f32 %v848_v21, %v778_v30  ;;  %v904_v22 = vmul.f32 %v2049_v57, %v888_v2  ;;  %v1033_v10 = vpop.f32.mrf.mxu3 }
 0x18f   : > { %1393 = vst [vmem:[%s2263_s2 + $0x60] sm:$0xff] %v1146_v44  ;;  %v861_v28 = vadd.f32 %v857_v16, %v787_v62  ;;  %v899_v25 = vadd.f32 %v895_v31, %v825_v59  ;;  %v913_v54 = vmul.f32 %v2052_v5, %v888_v2  ;;  %v922_v12 = vmul.f32 %v2061_v36, %v888_v2 }
 0x190   : > { %1397 = vst [vmem:[%s2263_s2 + $0x80] sm:$0xff] %v1164_v48  ;;  %v908_v17 = vadd.f32 %v904_v22, %v834_v3  ;;  %v931_v60 = vmul.f32 %v2064_v37, %v888_v2  ;;  %v969_v39 = vmul.f32 %v2069_v40, %v962_v29  ;;  %v978_v63 = vmul.f32 %v2072_v52, %v962_v29 }
 0x191   : > { %v917_v41 = vadd.f32 %v913_v54, %v843_v19  ;;  %v926_v18 = vadd.f32 %v922_v12, %v852_v53  ;;  %v987_v58 = vmul.f32 %v2075_v24, %v962_v29  ;;  %v996_v57 = vmul.f32 %v2081_v46, %v962_v29 }
 0x192   : > { %v935_v47 = vadd.f32 %v931_v60, %v861_v28  ;;  %v973_v55 = vadd.f32 %v969_v39, %v899_v25  ;;  %v982_v5 = vadd.f32 %v978_v63, %v908_v17  ;;  %v1005_v36 = vmul.f32 %v2084_v8, %v962_v29 }
 0x193   : > { %v2284_v30 = vadd.f32 %v987_v58, %v917_v41  ;;  %v2286_v62 = vadd.f32 %v996_v57, %v926_v18  ;;  %v1041_v37 = vmul.f32 %v2198_v49, %v1030_v4  ;;  %v1050_v40 = vmul.f32 %v2205_v27, %v1030_v4 }
 0x194   : > { %v2290_v52 = vadd.f32 %v1005_v36, %v935_v47  ;;  %v1059_v24 = vmul.f32 %v2208_v51, %v1030_v4  ;;  %v1068_v46 = vmul.f32 %v2215_v42, %v1030_v4  ;;  %v1077_v2 = vmul.f32 %v2220_v26, %v1030_v4 }
 0x195   : > { %v1045_v56 = vadd.f32 %v1041_v37, %v2133_v34  ;;  %v1054_v8 = vadd.f32 %v1050_v40, %v2135_v32  ;;  %v1042_v13 = vmul.f32 %v2198_v49, %v1033_v10  ;;  %v1051_v43 = vmul.f32 %v2205_v27, %v1033_v10 }
 0x196   : > { %v1063_v7 = vadd.f32 %v1059_v24, %v2143_v20  ;;  %v1072_v44 = vadd.f32 %v1068_v46, %v2145_v38  ;;  %v1081_v15 = vadd.f32 %v1077_v2, %v2155_v9  ;;  %v1060_v45 = vmul.f32 %v2208_v51, %v1033_v10 }
 0x197   : > { %v1086_v21 = vadd.f32 %v2223_v6, %v1045_v56  ;;  %v1103_v4 = vadd.f32 %v2233_v11, %v1054_v8  ;;  %v1046_v34 = vadd.f32 %v1042_v13, %v2189_v33  ;;  %v1055_v32 = vadd.f32 %v1051_v43, %v2192_v61 }
 0x198   : > { %v1121_v48 = vadd.f32 %v2238_v0, %v1063_v7  ;;  %v1139_v59 = vadd.f32 %v2241_v35, %v1072_v44  ;;  %v1157_v20 = vadd.f32 %v2247_v23, %v1081_v15  ;;  %v1064_v38 = vadd.f32 %v1060_v45, %v2194_v1  ;;  %v1036_v1 = vpop.f32.mrf.mxu3 }
 0x199   : > { %v1090_v16 = vmul.f32 0.43, %v1086_v21  ;;  %v1107_v9 = vmul.f32 0.43, %v1103_v4  ;;  %v1069_v31 = vmul.f32 %v2215_v42, %v1033_v10  ;;  %v1078_v29 = vmul.f32 %v2220_v26, %v1033_v10 }
 0x19a   : > { %v1125_v3 = vmul.f32 0.43, %v1121_v48  ;;  %v1143_v19 = vmul.f32 0.43, %v1139_v59  ;;  %v1161_v33 = vmul.f32 0.43, %v1157_v20  ;;  %v1087_v61 = vadd.f32 %v2223_v6, %v1046_v34 }
 0x19b   : > { %v1094_v53 = vmax.f32 %v1086_v21, %v1090_v16  ;;  %v1111_v22 = vmax.f32 %v1103_v4, %v1107_v9  ;;  %v1073_v28 = vadd.f32 %v1069_v31, %v2200_v50  ;;  %v1082_v25 = vadd.f32 %v1078_v29, %v2210_v14 }
 0x19c   : > { %v1129_v54 = vmax.f32 %v1121_v48, %v1125_v3  ;;  %v1147_v12 = vmax.f32 %v1139_v59, %v1143_v19  ;;  %v1165_v17 = vmax.f32 %v1157_v20, %v1161_v33  ;;  %v1091_v60 = vmul.f32 0.43, %v1087_v61 }
 0x19d   : > { %1098 = vst [vmem:[%s2263_s2 + $0x8] sm:$0xff] %v1094_v53  ;;  %v1104_v39 = vadd.f32 %v2233_v11, %v1055_v32  ;;  %v1122_v63 = vadd.f32 %v2238_v0, %v1064_v38  ;;  %v1140_v41 = vadd.f32 %v2241_v35, %v1073_v28  ;;  %v1158_v18 = vadd.f32 %v2247_v23, %v1082_v25 }
 0x19e   : > { %1386 = vst [vmem:[%s2263_s2 + $0x28] sm:$0xff] %v1111_v22  ;;  %v1095_v50 = vmax.f32 %v1087_v61, %v1091_v60  ;;  %v1043_v14 = vmul.f32 %v2198_v49, %v1036_v1  ;;  %v1052_v58 = vmul.f32 %v2205_v27, %v1036_v1  ;;  %v1061_v57 = vmul.f32 %v2208_v51, %v1036_v1 }
 0x19f   : > { %1390 = vst [vmem:[%s2263_s2 + $0x48] sm:$0xff] %v1129_v54  ;;  %v1108_v10 = vmul.f32 0.43, %v1104_v39  ;;  %v1126_v47 = vmul.f32 0.43, %v1122_v63  ;;  %v1070_v36 = vmul.f32 %v2215_v42, %v1036_v1  ;;  %v1079_v37 = vmul.f32 %v2220_v26, %v1036_v1 }
 0x1a0   : > { %1394 = vst [vmem:[%s2263_s2 + $0x68] sm:$0xff] %v1147_v12  ;;  %v1144_v40 = vmul.f32 0.43, %v1140_v41  ;;  %v1162_v24 = vmul.f32 0.43, %v1158_v18  ;;  %v1047_v46 = vadd.f32 %v1043_v14, %v973_v55  ;;  %v1056_v2 = vadd.f32 %v1052_v58, %v982_v5 }
 0x1a1   : > { %1398 = vst [vmem:[%s2263_s2 + $0x88] sm:$0xff] %v1165_v17  ;;  %v1112_v49 = vmax.f32 %v1104_v39, %v1108_v10  ;;  %v1130_v27 = vmax.f32 %v1122_v63, %v1126_v47  ;;  %v1065_v51 = vadd.f32 %v1061_v57, %v2284_v30  ;;  %v1074_v56 = vadd.f32 %v1070_v36, %v2286_v62 }
 0x1a2   : > { %1099 = vst [vmem:[%s2263_s2 + $0x10] sm:$0xff] %v1095_v50  ;;  %v1148_v42 = vmax.f32 %v1140_v41, %v1144_v40  ;;  %v1166_v26 = vmax.f32 %v1158_v18, %v1162_v24  ;;  %v1083_v8 = vadd.f32 %v1079_v37, %v2290_v52  ;;  %v1088_v13 = vadd.f32 %v2223_v6, %v1047_v46 }
 0x1a3   : > { %1387 = vst [vmem:[%s2263_s2 + $0x30] sm:$0xff] %v1112_v49  ;;  %v1105_v55 = vadd.f32 %v2233_v11, %v1056_v2  ;;  %v1123_v5 = vadd.f32 %v2238_v0, %v1065_v51  ;;  %v1141_v43 = vadd.f32 %v2241_v35, %v1074_v56 }
 0x1a4   : > { %1391 = vst [vmem:[%s2263_s2 + $0x50] sm:$0xff] %v1130_v27  ;;  %v1092_v30 = vmul.f32 0.43, %v1088_v13  ;;  %v1159_v62 = vadd.f32 %v2247_v23, %v1083_v8 }
 0x1a5   : > { %1395 = vst [vmem:[%s2263_s2 + $0x70] sm:$0xff] %v1148_v42  ;;  %v1109_v6 = vmul.f32 0.43, %v1105_v55  ;;  %v1127_v52 = vmul.f32 0.43, %v1123_v5 }
 0x1a6   : > { %1399 = vst [vmem:[%s2263_s2 + $0x90] sm:$0xff] %v1166_v26  ;;  %v1096_v11 = vmax.f32 %v1088_v13, %v1092_v30  ;;  %v1145_v0 = vmul.f32 0.43, %v1141_v43  ;;  %v1163_v35 = vmul.f32 0.43, %v1159_v62 }
 0x1a7   : > { %v1113_v7 = vmax.f32 %v1105_v55, %v1109_v6  ;;  %v1131_v44 = vmax.f32 %v1123_v5, %v1127_v52 }
 0x1a8   : > { %1100 = vst [vmem:[%s2263_s2 + $0x18] sm:$0xff] %v1096_v11  ;;  %v1149_v23 = vmax.f32 %v1141_v43, %v1145_v0  ;;  %v1167_v15 = vmax.f32 %v1159_v62, %v1163_v35 }
 0x1a9   : > { %1388 = vst [vmem:[%s2263_s2 + $0x38] sm:$0xff] %v1113_v7 }
 0x1aa   : > { %1392 = vst [vmem:[%s2263_s2 + $0x58] sm:$0xff] %v1131_v44 }
 0x1ab   : > { %1396 = vst [vmem:[%s2263_s2 + $0x78] sm:$0xff] %v1149_v23 }
 0x1ac   : > { %1400 = vst [vmem:[%s2263_s2 + $0x98] sm:$0xff] %v1167_v15 }
 0x1ad   : > { %1527 = shalt.err (!%p1524_p8)
}
 0x1ae   : > { %s1574_s13 = smov 128   ;;  %s1575_s14 = smov 8  }
 0x1af   : > { %1416 = dma.vmem_to_hbm [thread:$0]  (%p1644_p5), %s1187_s24, 2560, %s1189_s27, %s1174_s29, %s1574_s13, %s1574_s13, %s1575_s14  }
 0x1b0 PF: > { %p1433_p9 = scmp.ge.s32.totalorder %s1570_s21, 2  ;;  %s1203_s16 = sand.u32 1, %s1558_s18  }
 0x1b1   : > { %s1204_s17 = scalar_lea.sflag [#allocation3], %s1203_s16 }
 0x1b2   : > { %p1426_p10 = pnand %p1433_p9, %p1648_p6 }
 0x1b4   : > { %p1427_p11 = pneg %p1426_p10 }
 0x1b6   : > { %1553 = dma.done.wait (%p1427_p11), %s1204_s17, 2560  }
 0x1b7   : > { %1555 = vsyncadd (%p1427_p11), %s1204_s17, 4294964736  ;;  %s2416_s21 = sld [smem:[#allocation12_spill]]  ;;  %s2419_s18 = smov %s1562_s19 }
 0x1b8   : > { %s2417_s23 = sld [smem:[#allocation11_spill]] }
 0x1b9   : > { %s2418_s20 = sld [smem:[#allocation13_spill]] }
 0x1bd   : > { %p17_p12 = scmp.ge.s32.totalorder %s2416_s21, 4  }
 0x1be   : > { %s2420_s19 = smov %s2417_s23 }
 0x1bf   :  { %19 = sbr.rel (!%p17_p12) target bundleno = 11 (0xb), region = 92 }
 0x1c4   :  { %1210 = vsyncpa [#allocation3], 1 }
 0x1c5   :  { %1212 = vsyncpa [#allocation3 + $0x1], 1 }
 0x1c6   :  { %1213 = vsyncpa [#allocation4], 1 }
 0x1c7   :  { %1215 = vsyncpa [#allocation4 + $0x1], 1 }
 0x1c8   :  { %1216 = vsyncpa [#allocation6], 1 }

</bundles_post_ra>
